<compile_context>
chip_gen: v7x
topology: tpu7x:2x2x1
jax: 0.10.0
libtpu: 0.0.40
codegen_flags: <defaults>
</compile_context>

<pallas_src>
import jax
import jax.numpy as jnp
from jax.experimental import pallas as pl
from jax.experimental.pallas import tpu as pltpu


def b3db_kernel(x_ref, a_ref, seg_ref,
                w1a_ref, w1b_ref, w2a_ref, w2b_ref,
                w3a_ref, w3b_ref, w4a_ref, w4b_ref,
                wg3_ref, att_ref, gatew_ref, wf1_ref, wf2_ref, bias_ref,
                out_ref):
    f32 = jnp.float32
    neg = jnp.float32(-1e9)

    a_blk = a_ref[0]                       # [Nb, Nb] block-diag adjacency (+ I)
    edge_mask = a_blk > 0.0                # GAT mask: edges + self loops
    x = x_ref[0]                           # [Nb, Cin]
    seg = seg_ref[0]                       # [Nb, Gb] node -> local-graph one-hot

    def bias(row, width):                  # packed bias/scale slab, static slice
        return bias_ref[row:row + 1, :width]

    def gin_block(h, wa_ref_, wb_ref_, row_a, row_b):
        # GINConv: nn((1+eps)*x_i + sum_{j->i} x_j), eps=0 folded into a_blk.
        wa = wa_ref_[...]
        wb = wb_ref_[...]                  # BN scale folded in host-side
        ci, ch = wa.shape
        co = wb.shape[1]
        if ci <= ch:
            # aggregate first: cheaper N^2 matmul on the narrower width
            agg = jnp.dot(a_blk, h, preferred_element_type=f32)
            z = jnp.dot(agg, wa, preferred_element_type=f32)
        else:
            # project first (e.g. layer 4: 128 -> 64)
            proj = jnp.dot(h, wa, preferred_element_type=f32)
            z = jnp.dot(a_blk, proj, preferred_element_type=f32)
        z = jnp.maximum(z + bias(row_a, ch), 0.0)
        z = jnp.dot(z, wb, preferred_element_type=f32) + bias(row_b, co)
        return jnp.maximum(z, 0.0)         # ReLU (Dropout = identity in eval)

    h = gin_block(x, w1a_ref, w1b_ref, 0, 1)
    h = gin_block(h, w2a_ref, w2b_ref, 2, 3)
    h = gin_block(h, w3a_ref, w3b_ref, 4, 5)
    h = gin_block(h, w4a_ref, w4b_ref, 6, 7)          # [Nb, 2H]

    # --- GATConv (heads, concat=False -> mean over heads), fully vectorised ---
    wg3 = wg3_ref[...]                                 # [heads, 2H, Hd]
    heads, two_h, hd = wg3.shape
    nb = h.shape[0]
    h3 = jnp.broadcast_to(h[None], (heads, nb, two_h))
    xw3 = jnp.einsum('hnc,hcd->hnd', h3, wg3,
                     preferred_element_type=f32)       # [heads, Nb, Hd]
    asrc = att_ref[:, 0:1, :]                          # [heads, 1, Hd]
    adst = att_ref[:, 1:2, :]
    a_s = jnp.einsum('hkd,hnd->hkn', asrc, xw3,
                     preferred_element_type=f32)       # [heads, 1, Nb]
    a_d = jnp.einsum('hnd,hkd->hnk', xw3, adst,
                     preferred_element_type=f32)       # [heads, Nb, 1]
    e = a_d + a_s                                      # [heads, Nb, Nb]
    e = jnp.where(e > 0, e, 0.2 * e)                   # leaky_relu(0.2)
    e = jnp.where(edge_mask[None], e, neg)             # mask non-edges
    e = e - jnp.max(e, axis=-1, keepdims=True)         # one row-max for all heads
    p = jnp.exp(e)                                     # one exp for all heads
    p = p / jnp.sum(p, axis=-1, keepdims=True)
    acc3 = jnp.einsum('hij,hjd->hid', p, xw3,
                      preferred_element_type=f32)      # batched MXU aggregation
    acc = jnp.sum(acc3, axis=0)                        # sum over heads
    # mean-over-heads + GAT bias + bn5 folded into rows 8 / 9 of the slab
    h5 = jnp.maximum(acc * bias(8, hd) + bias(9, hd), 0.0)   # [Nb, Hd]

    # --- GlobalAttention pooling: segmented softmax over each graph ---
    lg = jnp.dot(h5, gatew_ref[...], preferred_element_type=f32) + bias(10, 1)
    egate = jnp.where(seg > 0, lg, neg)                # [Nb, Gb]
    egate = egate - jnp.max(egate, axis=0, keepdims=True)
    pg = jnp.exp(egate)
    pg = pg / jnp.sum(pg, axis=0, keepdims=True)
    pg = pg * seg                                      # exact zero for padded nodes
    pooled = jnp.einsum('ng,nd->gd', pg, h5,
                        preferred_element_type=f32)    # [Gb, Hd] on the MXU

    # --- MLP head (fc2 padded to a lane-dense 128-wide output block) ---
    f1 = jnp.dot(pooled, wf1_ref[...], preferred_element_type=f32) \
        + bias(11, wf1_ref.shape[1])
    f1 = jnp.maximum(f1, 0.0)
    out = jnp.dot(f1, wf2_ref[...], preferred_element_type=f32) \
        + bias(12, wf2_ref.shape[1])
    out_ref[0] = out.astype(out_ref.dtype)


def b3db_forward(x, edge_index, batch, weight_list, bias_slab, *,
                 output_dim, num_graphs, n_per_graph, target_block_rows=256):
    N, in_dim = x.shape
    Np = n_per_graph
    assert N == num_graphs * Np, "graphs must be contiguous & equal-sized"
    # TODO(synk): ragged graphs require padding every graph to n_per_graph
    # nodes (padded nodes: no edges, excluded from seg); this wrapper assumes
    # contiguous, equal-sized graphs as produced in __main__.

    f32 = jnp.float32
    # graph batching: Gb graphs per grid step so matmul M ~ target_block_rows
    Gb = max(1, min(num_graphs, target_block_rows // Np)) if Np <= target_block_rows else 1
    num_blocks = -(-num_graphs // Gb)
    G_pad = num_blocks * Gb
    Nb = Gb * Np
    Npad = G_pad * Np
    OUT_PAD = int(weight_list[-1].shape[1])

    src = edge_index[0].astype(jnp.int32)
    dst = edge_index[1].astype(jnp.int32)

    # block-diagonal adjacency built directly per block via local-index scatter
    # (.add so duplicate edges sum, matching PyG GINConv message sums)
    blk = dst // Nb
    a_bd = jnp.zeros((num_blocks, Nb, Nb), f32)
    a_bd = a_bd.at[blk, dst - blk * Nb, src - blk * Nb].add(1.0)
    a_bd = a_bd + jnp.eye(Nb, dtype=f32)[None]          # + (1 + eps)*I, eps = 0

    xb = jnp.zeros((Npad, in_dim), f32).at[:N].set(x.astype(f32))
    xb = xb.reshape(num_blocks, Nb, in_dim)

    gid = jnp.full((Npad,), -1, jnp.int32).at[:N].set(batch.astype(jnp.int32))
    local = gid.reshape(num_blocks, Nb) \
        - jnp.arange(num_blocks, dtype=jnp.int32)[:, None] * Gb
    seg = (local[:, :, None] ==
           jnp.arange(Gb, dtype=jnp.int32)[None, None, :]).astype(f32)

    args = [xb, a_bd, seg] + list(weight_list) + [bias_slab]

    def const_spec(arr):
        nd = arr.ndim
        return pl.BlockSpec(arr.shape, lambda b, _nd=nd: (0,) * _nd)

    in_specs = ([pl.BlockSpec((1, Nb, in_dim), lambda b: (b, 0, 0)),
                 pl.BlockSpec((1, Nb, Nb), lambda b: (b, 0, 0)),
                 pl.BlockSpec((1, Nb, Gb), lambda b: (b, 0, 0))]
                + [const_spec(p) for p in weight_list]
                + [const_spec(bias_slab)])
    out_specs = pl.BlockSpec((1, Gb, OUT_PAD), lambda b: (b, 0, 0))

    # rough cost estimate (per block, scaled by num_blocks)
    H = int(weight_list[0].shape[1])
    heads, two_h, Hd = (int(s) for s in weight_list[8].shape)
    gin_dims = [(in_dim, H, H), (H, 2 * H, 2 * H),
                (2 * H, 4 * H, 4 * H), (4 * H, 2 * H, 2 * H)]
    flops = 0
    for ci, ch, co in gin_dims:
        flops += 2 * Nb * Nb * min(ci, ch) + 2 * Nb * ci * ch + 2 * Nb * ch * co
    flops += heads * (2 * Nb * two_h * Hd + 4 * Nb * Hd + 2 * Nb * Nb * Hd)
    flops += 2 * Nb * Hd + 2 * Nb * Gb * Hd
    flops += 2 * Gb * Hd * int(weight_list[11].shape[1])
    flops += 2 * Gb * int(weight_list[12].shape[0]) * OUT_PAD
    flops *= num_blocks
    transc = num_blocks * (heads * Nb * Nb + Nb * Gb)
    wbytes = 4 * (sum(int(w.size) for w in weight_list) + int(bias_slab.size))
    bytes_acc = 4 * (int(xb.size) + int(a_bd.size) + int(seg.size)) \
        + wbytes + 4 * num_blocks * Gb * OUT_PAD
    per_step = 4 * (Nb * Nb + Nb * in_dim + Nb * Gb + 4 * heads * Nb * Nb)
    vmem_limit = int(min(32 * 2 ** 20, max(16 * 2 ** 20, 2 * per_step + 2 * wbytes)))

    out = pl.pallas_call(
        b3db_kernel,
        out_shape=jax.ShapeDtypeStruct((num_blocks, Gb, OUT_PAD), f32),
        grid=(num_blocks,),
        in_specs=in_specs,
        out_specs=out_specs,
        compiler_params=pltpu.CompilerParams(
            dimension_semantics=("parallel",),
            vmem_limit_bytes=vmem_limit),
        cost_estimate=pl.CostEstimate(flops=int(flops),
                                      transcendentals=int(transc),
                                      bytes_accessed=int(bytes_acc)),
    )(*args)
    return out.reshape(G_pad, OUT_PAD)[:num_graphs, :output_dim]


def make_raw_params(key, input_dim, hidden_dim, num_heads, output_dim):
    keys = iter(jax.random.split(key, 64))

    def lin(i, o):
        w = jax.random.normal(next(keys), (i, o), jnp.float32) * (float(i) ** -0.5)
        b = jax.random.normal(next(keys), (1, o), jnp.float32) * 0.01
        return w, b

    def bn(c):
        gamma = 1.0 + 0.1 * jax.random.normal(next(keys), (1, c), jnp.float32)
        beta = 0.1 * jax.random.normal(next(keys), (1, c), jnp.float32)
        mean = jnp.zeros((1, c), jnp.float32)
        var = jnp.ones((1, c), jnp.float32)
        scale = gamma / jnp.sqrt(var + 1e-5)
        shift = beta - mean * scale
        return scale, shift

    H = hidden_dim
    raw = {"gin": []}
    for ci, ch, co in [(input_dim, H, H), (H, 2 * H, 2 * H),
                       (2 * H, 4 * H, 4 * H), (4 * H, 2 * H, 2 * H)]:
        wa, ba = lin(ci, ch)
        wb, bb = lin(ch, co)
        s, t = bn(co)
        raw["gin"].append((wa, ba, wb, bb, s, t))
    wg, _ = lin(2 * H, num_heads * H)
    asrc = jax.random.normal(next(keys), (num_heads, H), jnp.float32) * (float(H) ** -0.5)
    adst = jax.random.normal(next(keys), (num_heads, H), jnp.float32) * (float(H) ** -0.5)
    bg = jax.random.normal(next(keys), (1, H), jnp.float32) * 0.01
    s5, t5 = bn(H)
    raw["gat"] = (wg, asrc, adst, bg, s5, t5)
    raw["gate"] = lin(H, 1)
    raw["fc1"] = lin(H, 128)
    raw["fc2"] = lin(128, output_dim)
    return raw


def prepare_kernel_params(raw, num_heads, hidden_dim, output_dim):
    """Fold eval-mode BatchNorm / GAT mean-over-heads, pack biases into one
    slab, restack GAT weights per head, pad fc2 to a lane-dense width."""
    f32 = jnp.float32
    H = hidden_dim
    out_pad = ((output_dim + 127) // 128) * 128
    width = max(128, 4 * H, out_pad)

    def pad_row(v):
        v = v.astype(f32).reshape(1, -1)
        return jnp.zeros((1, width), f32).at[:, :v.shape[1]].set(v)

    weights, rows = [], []
    for wa, ba, wb, bb, s, t in raw["gin"]:
        weights += [wa.astype(f32), (wb * s).astype(f32)]       # BN folded into wb
        rows += [pad_row(ba), pad_row(bb * s + t)]               # ... and its bias
    wg, asrc, adst, bg, s5, t5 = raw["gat"]
    heads, hd = asrc.shape
    wg3 = wg.astype(f32).reshape(2 * H, heads, hd).transpose(1, 0, 2)   # [heads,2H,Hd]
    att = jnp.stack([asrc, adst], axis=1).astype(f32)                    # [heads,2,Hd]
    weights += [wg3, att]
    rows += [pad_row(s5 / float(num_heads)),                    # scale5 = bn5_scale/heads
             pad_row(bg * s5 + t5)]                             # shift5 = bias*scale+shift
    gw, gb = raw["gate"]
    weights += [gw.astype(f32)]
    rows += [pad_row(gb)]
    w1, b1 = raw["fc1"]
    weights += [w1.astype(f32)]
    rows += [pad_row(b1)]
    w2, b2 = raw["fc2"]
    w2p = jnp.zeros((w2.shape[0], out_pad), f32).at[:, :output_dim].set(w2.astype(f32))
    weights += [w2p]
    rows += [pad_row(b2)]
    slab = jnp.concatenate(rows, axis=0)                         # [13, width]
    n_rows = ((slab.shape[0] + 7) // 8) * 8
    slab = jnp.zeros((n_rows, width), f32).at[:slab.shape[0]].set(slab)
    return weights, slab


if __name__ == "__main__":
    key = jax.random.PRNGKey(0)
    input_dim, hidden_dim, output_dim, num_heads = 16, 32, 4, 8
    n_per_graph, num_graphs = 8, 2
    n = n_per_graph * num_graphs

    kx, kp = jax.random.split(key)
    x = jax.random.normal(kx, (n, input_dim), jnp.float32)

    # Undirected ring within each graph (both edge directions).
    src_list, dst_list = [], []
    for g in range(num_graphs):
        base = g * n_per_graph
        for i in range(n_per_graph):
            a = base + i
            b = base + (i + 1) % n_per_graph
            src_list += [a, b]
            dst_list += [b, a]
    edge_index = jnp.array([src_list, dst_list], dtype=jnp.int32)
    batch = jnp.repeat(jnp.arange(num_graphs, dtype=jnp.int32), n_per_graph)

    raw = make_raw_params(kp, input_dim, hidden_dim, num_heads, output_dim)
    weight_list, bias_slab = prepare_kernel_params(raw, num_heads, hidden_dim,
                                                   output_dim)

    out = b3db_forward(x, edge_index, batch, weight_list, bias_slab,
                       output_dim=output_dim, num_graphs=num_graphs,
                       n_per_graph=n_per_graph)
    out = jax.block_until_ready(out)
    assert out.shape == (num_graphs, output_dim)
    assert bool(jnp.all(jnp.isfinite(out)))
    print("KERNEL_OK")
</pallas_src>

<mosaic_0001>
module attributes {stable_mosaic.version = 11 : i64} {
  func.func @b3db_kernel(%arg0: i32, %arg1: memref<1x16x16xf32, #tpu.memory_space<vmem>>, %arg2: memref<1x16x16xf32, #tpu.memory_space<vmem>>, %arg3: memref<1x16x2xf32, #tpu.memory_space<vmem>>, %arg4: memref<16x32xf32, #tpu.memory_space<vmem>>, %arg5: memref<32x32xf32, #tpu.memory_space<vmem>>, %arg6: memref<32x64xf32, #tpu.memory_space<vmem>>, %arg7: memref<64x64xf32, #tpu.memory_space<vmem>>, %arg8: memref<64x128xf32, #tpu.memory_space<vmem>>, %arg9: memref<128x128xf32, #tpu.memory_space<vmem>>, %arg10: memref<128x64xf32, #tpu.memory_space<vmem>>, %arg11: memref<64x64xf32, #tpu.memory_space<vmem>>, %arg12: memref<8x64x32xf32, #tpu.memory_space<vmem>>, %arg13: memref<8x2x32xf32, #tpu.memory_space<vmem>>, %arg14: memref<32x1xf32, #tpu.memory_space<vmem>>, %arg15: memref<32x128xf32, #tpu.memory_space<vmem>>, %arg16: memref<128x128xf32, #tpu.memory_space<vmem>>, %arg17: memref<16x128xf32, #tpu.memory_space<vmem>>, %arg18: memref<1x2x128xf32, #tpu.memory_space<vmem>>) attributes {dimension_semantics = [#tpu.dimension_semantics<parallel>], iteration_bounds = array<i64: 1>, scalar_prefetch = 0 : i64, scratch_operands = 0 : i64, tpu.core_type = #tpu.core_type<tc>, window_params = [{transform_indices = @transform_0, window_bounds = array<i64: 1, 16, 16>}, {transform_indices = @transform_1, window_bounds = array<i64: 1, 16, 16>}, {transform_indices = @transform_2, window_bounds = array<i64: 1, 16, 2>}, {pipeline_mode = #tpu.pipeline_mode<synchronous>, transform_indices = @transform_3, window_bounds = array<i64: 16, 32>}, {pipeline_mode = #tpu.pipeline_mode<synchronous>, transform_indices = @transform_4, window_bounds = array<i64: 32, 32>}, {pipeline_mode = #tpu.pipeline_mode<synchronous>, transform_indices = @transform_5, window_bounds = array<i64: 32, 64>}, {pipeline_mode = #tpu.pipeline_mode<synchronous>, transform_indices = @transform_6, window_bounds = array<i64: 64, 64>}, {pipeline_mode = #tpu.pipeline_mode<synchronous>, transform_indices = @transform_7, window_bounds = array<i64: 64, 128>}, {pipeline_mode = #tpu.pipeline_mode<synchronous>, transform_indices = @transform_8, window_bounds = array<i64: 128, 128>}, {pipeline_mode = #tpu.pipeline_mode<synchronous>, transform_indices = @transform_9, window_bounds = array<i64: 128, 64>}, {pipeline_mode = #tpu.pipeline_mode<synchronous>, transform_indices = @transform_10, window_bounds = array<i64: 64, 64>}, {pipeline_mode = #tpu.pipeline_mode<synchronous>, transform_indices = @transform_11, window_bounds = array<i64: 8, 64, 32>}, {pipeline_mode = #tpu.pipeline_mode<synchronous>, transform_indices = @transform_12, window_bounds = array<i64: 8, 2, 32>}, {pipeline_mode = #tpu.pipeline_mode<synchronous>, transform_indices = @transform_13, window_bounds = array<i64: 32, 1>}, {pipeline_mode = #tpu.pipeline_mode<synchronous>, transform_indices = @transform_14, window_bounds = array<i64: 32, 128>}, {pipeline_mode = #tpu.pipeline_mode<synchronous>, transform_indices = @transform_15, window_bounds = array<i64: 128, 128>}, {pipeline_mode = #tpu.pipeline_mode<synchronous>, transform_indices = @transform_16, window_bounds = array<i64: 16, 128>}, {transform_indices = @transform_17, window_bounds = array<i64: 1, 2, 128>}]} {
    %c0 = arith.constant 0 : index
    %c0_0 = arith.constant 0 : index
    %c0_1 = arith.constant 0 : index
    %0 = vector.load %arg2[%c0, %c0_0, %c0_1] : memref<1x16x16xf32, #tpu.memory_space<vmem>>, vector<1x16x16xf32>
    %1 = vector.shape_cast %0 : vector<1x16x16xf32> to vector<16x16xf32>
    %cst = arith.constant 0.000000e+00 : f32
    %2 = vector.broadcast %cst : f32 to vector<16x16xf32>
    %3 = arith.cmpf ogt, %1, %2 : vector<16x16xf32>
    %c0_2 = arith.constant 0 : index
    %c0_3 = arith.constant 0 : index
    %c0_4 = arith.constant 0 : index
    %4 = vector.load %arg1[%c0_2, %c0_3, %c0_4] : memref<1x16x16xf32, #tpu.memory_space<vmem>>, vector<1x16x16xf32>
    %5 = vector.shape_cast %4 : vector<1x16x16xf32> to vector<16x16xf32>
    %c0_5 = arith.constant 0 : index
    %c0_6 = arith.constant 0 : index
    %c0_7 = arith.constant 0 : index
    %6 = vector.load %arg3[%c0_5, %c0_6, %c0_7] : memref<1x16x2xf32, #tpu.memory_space<vmem>>, vector<1x16x2xf32>
    %7 = vector.shape_cast %6 : vector<1x16x2xf32> to vector<16x2xf32>
    %c0_8 = arith.constant 0 : index
    %c0_9 = arith.constant 0 : index
    %8 = vector.load %arg4[%c0_8, %c0_9] : memref<16x32xf32, #tpu.memory_space<vmem>>, vector<16x32xf32>
    %c0_10 = arith.constant 0 : index
    %c0_11 = arith.constant 0 : index
    %9 = vector.load %arg5[%c0_10, %c0_11] : memref<32x32xf32, #tpu.memory_space<vmem>>, vector<32x32xf32>
    %cst_12 = arith.constant dense<0.000000e+00> : vector<16x16xf32>
    %10 = tpu.matmul %1, %5, %cst_12 {dimension_numbers = #tpu.dot_dimension_numbers<[1], [0], [0], [1], [0, 0, 1, 1], [], []>} : vector<16x16xf32>, vector<16x16xf32>, vector<16x16xf32> -> vector<16x16xf32>
    %cst_13 = arith.constant dense<0.000000e+00> : vector<16x32xf32>
    %11 = tpu.matmul %10, %8, %cst_13 {dimension_numbers = #tpu.dot_dimension_numbers<[1], [0], [0], [1], [0, 0, 1, 1], [], []>} : vector<16x16xf32>, vector<16x32xf32>, vector<16x32xf32> -> vector<16x32xf32>
    %c0_14 = arith.constant 0 : index
    %c0_15 = arith.constant 0 : index
    %12 = vector.load %arg17[%c0_14, %c0_15] : memref<16x128xf32, #tpu.memory_space<vmem>>, vector<1x32xf32>
    %13 = vector.broadcast %12 : vector<1x32xf32> to vector<16x32xf32>
    %14 = arith.addf %11, %13 : vector<16x32xf32>
    %cst_16 = arith.constant 0.000000e+00 : f32
    %15 = vector.broadcast %cst_16 : f32 to vector<16x32xf32>
    %16 = arith.maximumf %14, %15 : vector<16x32xf32>
    %cst_17 = arith.constant dense<0.000000e+00> : vector<16x32xf32>
    %17 = tpu.matmul %16, %9, %cst_17 {dimension_numbers = #tpu.dot_dimension_numbers<[1], [0], [0], [1], [0, 0, 1, 1], [], []>} : vector<16x32xf32>, vector<32x32xf32>, vector<16x32xf32> -> vector<16x32xf32>
    %c1 = arith.constant 1 : index
    %c0_18 = arith.constant 0 : index
    %18 = vector.load %arg17[%c1, %c0_18] : memref<16x128xf32, #tpu.memory_space<vmem>>, vector<1x32xf32>
    %19 = vector.broadcast %18 : vector<1x32xf32> to vector<16x32xf32>
    %20 = arith.addf %17, %19 : vector<16x32xf32>
    %cst_19 = arith.constant 0.000000e+00 : f32
    %21 = vector.broadcast %cst_19 : f32 to vector<16x32xf32>
    %22 = arith.maximumf %20, %21 : vector<16x32xf32>
    %c0_20 = arith.constant 0 : index
    %c0_21 = arith.constant 0 : index
    %23 = vector.load %arg6[%c0_20, %c0_21] : memref<32x64xf32, #tpu.memory_space<vmem>>, vector<32x64xf32>
    %c0_22 = arith.constant 0 : index
    %c0_23 = arith.constant 0 : index
    %24 = vector.load %arg7[%c0_22, %c0_23] : memref<64x64xf32, #tpu.memory_space<vmem>>, vector<64x64xf32>
    %cst_24 = arith.constant dense<0.000000e+00> : vector<16x32xf32>
    %25 = tpu.matmul %1, %22, %cst_24 {dimension_numbers = #tpu.dot_dimension_numbers<[1], [0], [0], [1], [0, 0, 1, 1], [], []>} : vector<16x16xf32>, vector<16x32xf32>, vector<16x32xf32> -> vector<16x32xf32>
    %cst_25 = arith.constant dense<0.000000e+00> : vector<16x64xf32>
    %26 = tpu.matmul %25, %23, %cst_25 {dimension_numbers = #tpu.dot_dimension_numbers<[1], [0], [0], [1], [0, 0, 1, 1], [], []>} : vector<16x32xf32>, vector<32x64xf32>, vector<16x64xf32> -> vector<16x64xf32>
    %c2 = arith.constant 2 : index
    %c0_26 = arith.constant 0 : index
    %27 = vector.load %arg17[%c2, %c0_26] : memref<16x128xf32, #tpu.memory_space<vmem>>, vector<1x64xf32>
    %28 = vector.broadcast %27 : vector<1x64xf32> to vector<16x64xf32>
    %29 = arith.addf %26, %28 : vector<16x64xf32>
    %cst_27 = arith.constant 0.000000e+00 : f32
    %30 = vector.broadcast %cst_27 : f32 to vector<16x64xf32>
    %31 = arith.maximumf %29, %30 : vector<16x64xf32>
    %cst_28 = arith.constant dense<0.000000e+00> : vector<16x64xf32>
    %32 = tpu.matmul %31, %24, %cst_28 {dimension_numbers = #tpu.dot_dimension_numbers<[1], [0], [0], [1], [0, 0, 1, 1], [], []>} : vector<16x64xf32>, vector<64x64xf32>, vector<16x64xf32> -> vector<16x64xf32>
    %c3 = arith.constant 3 : index
    %c0_29 = arith.constant 0 : index
    %33 = vector.load %arg17[%c3, %c0_29] : memref<16x128xf32, #tpu.memory_space<vmem>>, vector<1x64xf32>
    %34 = vector.broadcast %33 : vector<1x64xf32> to vector<16x64xf32>
    %35 = arith.addf %32, %34 : vector<16x64xf32>
    %cst_30 = arith.constant 0.000000e+00 : f32
    %36 = vector.broadcast %cst_30 : f32 to vector<16x64xf32>
    %37 = arith.maximumf %35, %36 : vector<16x64xf32>
    %c0_31 = arith.constant 0 : index
    %c0_32 = arith.constant 0 : index
    %38 = vector.load %arg8[%c0_31, %c0_32] : memref<64x128xf32, #tpu.memory_space<vmem>>, vector<64x128xf32>
    %c0_33 = arith.constant 0 : index
    %c0_34 = arith.constant 0 : index
    %39 = vector.load %arg9[%c0_33, %c0_34] : memref<128x128xf32, #tpu.memory_space<vmem>>, vector<128x128xf32>
    %cst_35 = arith.constant dense<0.000000e+00> : vector<16x64xf32>
    %40 = tpu.matmul %1, %37, %cst_35 {dimension_numbers = #tpu.dot_dimension_numbers<[1], [0], [0], [1], [0, 0, 1, 1], [], []>} : vector<16x16xf32>, vector<16x64xf32>, vector<16x64xf32> -> vector<16x64xf32>
    %cst_36 = arith.constant dense<0.000000e+00> : vector<16x128xf32>
    %41 = tpu.matmul %40, %38, %cst_36 {dimension_numbers = #tpu.dot_dimension_numbers<[1], [0], [0], [1], [0, 0, 1, 1], [], []>} : vector<16x64xf32>, vector<64x128xf32>, vector<16x128xf32> -> vector<16x128xf32>
    %c4 = arith.constant 4 : index
    %c0_37 = arith.constant 0 : index
    %42 = vector.load %arg17[%c4, %c0_37] : memref<16x128xf32, #tpu.memory_space<vmem>>, vector<1x128xf32>
    %43 = vector.broadcast %42 : vector<1x128xf32> to vector<16x128xf32>
    %44 = arith.addf %41, %43 : vector<16x128xf32>
    %cst_38 = arith.constant 0.000000e+00 : f32
    %45 = vector.broadcast %cst_38 : f32 to vector<16x128xf32>
    %46 = arith.maximumf %44, %45 : vector<16x128xf32>
    %cst_39 = arith.constant dense<0.000000e+00> : vector<16x128xf32>
    %47 = tpu.matmul %46, %39, %cst_39 {dimension_numbers = #tpu.dot_dimension_numbers<[1], [0], [0], [1], [0, 0, 1, 1], [], []>} : vector<16x128xf32>, vector<128x128xf32>, vector<16x128xf32> -> vector<16x128xf32>
    %c5 = arith.constant 5 : index
    %c0_40 = arith.constant 0 : index
    %48 = vector.load %arg17[%c5, %c0_40] : memref<16x128xf32, #tpu.memory_space<vmem>>, vector<1x128xf32>
    %49 = vector.broadcast %48 : vector<1x128xf32> to vector<16x128xf32>
    %50 = arith.addf %47, %49 : vector<16x128xf32>
    %cst_41 = arith.constant 0.000000e+00 : f32
    %51 = vector.broadcast %cst_41 : f32 to vector<16x128xf32>
    %52 = arith.maximumf %50, %51 : vector<16x128xf32>
    %c0_42 = arith.constant 0 : index
    %c0_43 = arith.constant 0 : index
    %53 = vector.load %arg10[%c0_42, %c0_43] : memref<128x64xf32, #tpu.memory_space<vmem>>, vector<128x64xf32>
    %c0_44 = arith.constant 0 : index
    %c0_45 = arith.constant 0 : index
    %54 = vector.load %arg11[%c0_44, %c0_45] : memref<64x64xf32, #tpu.memory_space<vmem>>, vector<64x64xf32>
    %cst_46 = arith.constant dense<0.000000e+00> : vector<16x64xf32>
    %55 = tpu.matmul %52, %53, %cst_46 {dimension_numbers = #tpu.dot_dimension_numbers<[1], [0], [0], [1], [0, 0, 1, 1], [], []>} : vector<16x128xf32>, vector<128x64xf32>, vector<16x64xf32> -> vector<16x64xf32>
    %cst_47 = arith.constant dense<0.000000e+00> : vector<16x64xf32>
    %56 = tpu.matmul %1, %55, %cst_47 {dimension_numbers = #tpu.dot_dimension_numbers<[1], [0], [0], [1], [0, 0, 1, 1], [], []>} : vector<16x16xf32>, vector<16x64xf32>, vector<16x64xf32> -> vector<16x64xf32>
    %c6 = arith.constant 6 : index
    %c0_48 = arith.constant 0 : index
    %57 = vector.load %arg17[%c6, %c0_48] : memref<16x128xf32, #tpu.memory_space<vmem>>, vector<1x64xf32>
    %58 = vector.broadcast %57 : vector<1x64xf32> to vector<16x64xf32>
    %59 = arith.addf %56, %58 : vector<16x64xf32>
    %cst_49 = arith.constant 0.000000e+00 : f32
    %60 = vector.broadcast %cst_49 : f32 to vector<16x64xf32>
    %61 = arith.maximumf %59, %60 : vector<16x64xf32>
    %cst_50 = arith.constant dense<0.000000e+00> : vector<16x64xf32>
    %62 = tpu.matmul %61, %54, %cst_50 {dimension_numbers = #tpu.dot_dimension_numbers<[1], [0], [0], [1], [0, 0, 1, 1], [], []>} : vector<16x64xf32>, vector<64x64xf32>, vector<16x64xf32> -> vector<16x64xf32>
    %c7 = arith.constant 7 : index
    %c0_51 = arith.constant 0 : index
    %63 = vector.load %arg17[%c7, %c0_51] : memref<16x128xf32, #tpu.memory_space<vmem>>, vector<1x64xf32>
    %64 = vector.broadcast %63 : vector<1x64xf32> to vector<16x64xf32>
    %65 = arith.addf %62, %64 : vector<16x64xf32>
    %cst_52 = arith.constant 0.000000e+00 : f32
    %66 = vector.broadcast %cst_52 : f32 to vector<16x64xf32>
    %67 = arith.maximumf %65, %66 : vector<16x64xf32>
    %c0_53 = arith.constant 0 : index
    %c0_54 = arith.constant 0 : index
    %c0_55 = arith.constant 0 : index
    %68 = vector.load %arg12[%c0_53, %c0_54, %c0_55] : memref<8x64x32xf32, #tpu.memory_space<vmem>>, vector<8x64x32xf32>
    %69 = vector.shape_cast %67 : vector<16x64xf32> to vector<1x16x64xf32>
    %70 = vector.shape_cast %69 : vector<1x16x64xf32> to vector<1x16x64xf32>
    %71 = vector.broadcast %70 : vector<1x16x64xf32> to vector<8x16x64xf32>
    "tpu.trace_start"() <{level = 10 : i32, message = "hnc,hcd->hnd"}> : () -> ()
    %cst_56 = arith.constant dense<0.000000e+00> : vector<8x16x32xf32>
    %72 = tpu.matmul %71, %68, %cst_56 {dimension_numbers = #tpu.dot_dimension_numbers<[2], [1], [1], [2], [0, 0, 0, 1, 1, 2], [0], [0]>} : vector<8x16x64xf32>, vector<8x64x32xf32>, vector<8x16x32xf32> -> vector<8x16x32xf32>
    "tpu.trace_stop"() : () -> ()
    %c0_57 = arith.constant 0 : index
    %c0_58 = arith.constant 0 : index
    %c0_59 = arith.constant 0 : index
    %73 = vector.load %arg13[%c0_57, %c0_58, %c0_59] : memref<8x2x32xf32, #tpu.memory_space<vmem>>, vector<8x1x32xf32>
    %c0_60 = arith.constant 0 : index
    %c1_61 = arith.constant 1 : index
    %c0_62 = arith.constant 0 : index
    %74 = vector.load %arg13[%c0_60, %c1_61, %c0_62] : memref<8x2x32xf32, #tpu.memory_space<vmem>>, vector<8x1x32xf32>
    "tpu.trace_start"() <{level = 10 : i32, message = "hkd,hnd->hkn"}> : () -> ()
    %cst_63 = arith.constant dense<0.000000e+00> : vector<8x1x16xf32>
    %75 = tpu.matmul %73, %72, %cst_63 {dimension_numbers = #tpu.dot_dimension_numbers<[2], [2], [1], [1], [0, 0, 0, 1, 1, 1], [0], [0]>} : vector<8x1x32xf32>, vector<8x16x32xf32>, vector<8x1x16xf32> -> vector<8x1x16xf32>
    "tpu.trace_stop"() : () -> ()
    "tpu.trace_start"() <{level = 10 : i32, message = "hnd,hkd->hnk"}> : () -> ()
    %cst_64 = arith.constant dense<0.000000e+00> : vector<8x16x1xf32>
    %76 = tpu.matmul %72, %74, %cst_64 {dimension_numbers = #tpu.dot_dimension_numbers<[2], [2], [1], [1], [0, 0, 0, 1, 1, 1], [0], [0]>} : vector<8x16x32xf32>, vector<8x1x32xf32>, vector<8x16x1xf32> -> vector<8x16x1xf32>
    "tpu.trace_stop"() : () -> ()
    %77 = vector.broadcast %76 : vector<8x16x1xf32> to vector<8x16x16xf32>
    %78 = vector.broadcast %75 : vector<8x1x16xf32> to vector<8x16x16xf32>
    %79 = arith.addf %77, %78 : vector<8x16x16xf32>
    %cst_65 = arith.constant 0.000000e+00 : f32
    %80 = vector.broadcast %cst_65 : f32 to vector<8x16x16xf32>
    %81 = arith.cmpf ogt, %79, %80 : vector<8x16x16xf32>
    %cst_66 = arith.constant 2.000000e-01 : f32
    %82 = vector.broadcast %cst_66 : f32 to vector<8x16x16xf32>
    %83 = arith.mulf %82, %79 : vector<8x16x16xf32>
    %84 = arith.select %81, %79, %83 : vector<8x16x16xi1>, vector<8x16x16xf32>
    %85 = vector.shape_cast %3 : vector<16x16xi1> to vector<1x16x16xi1>
    %cst_67 = arith.constant -1.000000e+09 : f32
    %86 = vector.shape_cast %85 : vector<1x16x16xi1> to vector<1x16x16xi1>
    %87 = vector.broadcast %86 : vector<1x16x16xi1> to vector<8x16x16xi1>
    %88 = vector.broadcast %cst_67 : f32 to vector<8x16x16xf32>
    %89 = arith.select %87, %84, %88 : vector<8x16x16xi1>, vector<8x16x16xf32>
    %cst_68 = arith.constant dense<0xFF800000> : vector<8x16xf32>
    %90 = vector.multi_reduction <maximumf>, %89, %cst_68 [2] : vector<8x16x16xf32> to vector<8x16xf32>
    %91 = vector.shape_cast %90 : vector<8x16xf32> to vector<8x16x1xf32>
    %92 = vector.broadcast %91 : vector<8x16x1xf32> to vector<8x16x16xf32>
    %93 = arith.subf %89, %92 : vector<8x16x16xf32>
    %94 = math.exp %93 : vector<8x16x16xf32>
    %cst_69 = arith.constant dense<0.000000e+00> : vector<8x16xf32>
    %95 = vector.multi_reduction <add>, %94, %cst_69 [2] : vector<8x16x16xf32> to vector<8x16xf32>
    %96 = vector.shape_cast %95 : vector<8x16xf32> to vector<8x16x1xf32>
    %97 = vector.broadcast %96 : vector<8x16x1xf32> to vector<8x16x16xf32>
    %98 = arith.divf %94, %97 : vector<8x16x16xf32>
    "tpu.trace_start"() <{level = 10 : i32, message = "hij,hjd->hid"}> : () -> ()
    %cst_70 = arith.constant dense<0.000000e+00> : vector<8x16x32xf32>
    %99 = tpu.matmul %98, %72, %cst_70 {dimension_numbers = #tpu.dot_dimension_numbers<[2], [1], [1], [2], [0, 0, 0, 1, 1, 2], [0], [0]>} : vector<8x16x16xf32>, vector<8x16x32xf32>, vector<8x16x32xf32> -> vector<8x16x32xf32>
    "tpu.trace_stop"() : () -> ()
    %cst_71 = arith.constant dense<0.000000e+00> : vector<16x32xf32>
    %100 = vector.multi_reduction <add>, %99, %cst_71 [0] : vector<8x16x32xf32> to vector<16x32xf32>
    %c8 = arith.constant 8 : index
    %c0_72 = arith.constant 0 : index
    %101 = vector.load %arg17[%c8, %c0_72] : memref<16x128xf32, #tpu.memory_space<vmem>>, vector<1x32xf32>
    %102 = vector.broadcast %101 : vector<1x32xf32> to vector<16x32xf32>
    %103 = arith.mulf %100, %102 : vector<16x32xf32>
    %c9 = arith.constant 9 : index
    %c0_73 = arith.constant 0 : index
    %104 = vector.load %arg17[%c9, %c0_73] : memref<16x128xf32, #tpu.memory_space<vmem>>, vector<1x32xf32>
    %105 = vector.broadcast %104 : vector<1x32xf32> to vector<16x32xf32>
    %106 = arith.addf %103, %105 : vector<16x32xf32>
    %cst_74 = arith.constant 0.000000e+00 : f32
    %107 = vector.broadcast %cst_74 : f32 to vector<16x32xf32>
    %108 = arith.maximumf %106, %107 : vector<16x32xf32>
    %c0_75 = arith.constant 0 : index
    %c0_76 = arith.constant 0 : index
    %109 = vector.load %arg14[%c0_75, %c0_76] : memref<32x1xf32, #tpu.memory_space<vmem>>, vector<32x1xf32>
    %cst_77 = arith.constant dense<0.000000e+00> : vector<16x1xf32>
    %110 = tpu.matmul %108, %109, %cst_77 {dimension_numbers = #tpu.dot_dimension_numbers<[1], [0], [0], [1], [0, 0, 1, 1], [], []>} : vector<16x32xf32>, vector<32x1xf32>, vector<16x1xf32> -> vector<16x1xf32>
    %c10 = arith.constant 10 : index
    %c0_78 = arith.constant 0 : index
    %111 = vector.load %arg17[%c10, %c0_78] : memref<16x128xf32, #tpu.memory_space<vmem>>, vector<1x1xf32>
    %112 = vector.broadcast %111 : vector<1x1xf32> to vector<16x1xf32>
    %113 = arith.addf %110, %112 : vector<16x1xf32>
    %cst_79 = arith.constant 0.000000e+00 : f32
    %114 = vector.broadcast %cst_79 : f32 to vector<16x2xf32>
    %115 = arith.cmpf ogt, %7, %114 : vector<16x2xf32>
    %cst_80 = arith.constant -1.000000e+09 : f32
    %116 = vector.shape_cast %113 : vector<16x1xf32> to vector<16x1xf32>
    %117 = vector.broadcast %116 : vector<16x1xf32> to vector<16x2xf32>
    %118 = vector.broadcast %cst_80 : f32 to vector<16x2xf32>
    %119 = arith.select %115, %117, %118 : vector<16x2xi1>, vector<16x2xf32>
    %cst_81 = arith.constant dense<0xFF800000> : vector<2xf32>
    %120 = vector.multi_reduction <maximumf>, %119, %cst_81 [0] : vector<16x2xf32> to vector<2xf32>
    %121 = vector.shape_cast %120 : vector<2xf32> to vector<1x2xf32>
    %122 = vector.broadcast %121 : vector<1x2xf32> to vector<16x2xf32>
    %123 = arith.subf %119, %122 : vector<16x2xf32>
    %124 = math.exp %123 : vector<16x2xf32>
    %cst_82 = arith.constant dense<0.000000e+00> : vector<2xf32>
    %125 = vector.multi_reduction <add>, %124, %cst_82 [0] : vector<16x2xf32> to vector<2xf32>
    %126 = vector.shape_cast %125 : vector<2xf32> to vector<1x2xf32>
    %127 = vector.broadcast %126 : vector<1x2xf32> to vector<16x2xf32>
    %128 = arith.divf %124, %127 : vector<16x2xf32>
    %129 = arith.mulf %128, %7 : vector<16x2xf32>
    "tpu.trace_start"() <{level = 10 : i32, message = "ng,nd->gd"}> : () -> ()
    %cst_83 = arith.constant dense<0.000000e+00> : vector<2x32xf32>
    %130 = tpu.matmul %129, %108, %cst_83 {dimension_numbers = #tpu.dot_dimension_numbers<[0], [0], [1], [1], [0, 1, 1, 1], [], []>} : vector<16x2xf32>, vector<16x32xf32>, vector<2x32xf32> -> vector<2x32xf32>
    "tpu.trace_stop"() : () -> ()
    %c0_84 = arith.constant 0 : index
    %c0_85 = arith.constant 0 : index
    %131 = vector.load %arg15[%c0_84, %c0_85] : memref<32x128xf32, #tpu.memory_space<vmem>>, vector<32x128xf32>
    %cst_86 = arith.constant dense<0.000000e+00> : vector<2x128xf32>
    %132 = tpu.matmul %130, %131, %cst_86 {dimension_numbers = #tpu.dot_dimension_numbers<[1], [0], [0], [1], [0, 0, 1, 1], [], []>} : vector<2x32xf32>, vector<32x128xf32>, vector<2x128xf32> -> vector<2x128xf32>
    %c11 = arith.constant 11 : index
    %c0_87 = arith.constant 0 : index
    %133 = vector.load %arg17[%c11, %c0_87] : memref<16x128xf32, #tpu.memory_space<vmem>>, vector<1x128xf32>
    %134 = vector.broadcast %133 : vector<1x128xf32> to vector<2x128xf32>
    %135 = arith.addf %132, %134 : vector<2x128xf32>
    %cst_88 = arith.constant 0.000000e+00 : f32
    %136 = vector.broadcast %cst_88 : f32 to vector<2x128xf32>
    %137 = arith.maximumf %135, %136 : vector<2x128xf32>
    %c0_89 = arith.constant 0 : index
    %c0_90 = arith.constant 0 : index
    %138 = vector.load %arg16[%c0_89, %c0_90] : memref<128x128xf32, #tpu.memory_space<vmem>>, vector<128x128xf32>
    %cst_91 = arith.constant dense<0.000000e+00> : vector<2x128xf32>
    %139 = tpu.matmul %137, %138, %cst_91 {dimension_numbers = #tpu.dot_dimension_numbers<[1], [0], [0], [1], [0, 0, 1, 1], [], []>} : vector<2x128xf32>, vector<128x128xf32>, vector<2x128xf32> -> vector<2x128xf32>
    %c12 = arith.constant 12 : index
    %c0_92 = arith.constant 0 : index
    %140 = vector.load %arg17[%c12, %c0_92] : memref<16x128xf32, #tpu.memory_space<vmem>>, vector<1x128xf32>
    %141 = vector.broadcast %140 : vector<1x128xf32> to vector<2x128xf32>
    %142 = arith.addf %139, %141 : vector<2x128xf32>
    %c0_93 = arith.constant 0 : index
    %c0_94 = arith.constant 0 : index
    %c0_95 = arith.constant 0 : index
    %143 = vector.load %arg18[%c0_93, %c0_94, %c0_95] : memref<1x2x128xf32, #tpu.memory_space<vmem>>, vector<1x2x128xf32>
    %144 = vector.shape_cast %143 : vector<1x2x128xf32> to vector<2x128xf32>
    %145 = vector.shape_cast %142 : vector<2x128xf32> to vector<1x2x128xf32>
    tpu.vector_store %arg18[%c0_93, %c0_94, %c0_95], %145 {strides = array<i32>} : memref<1x2x128xf32, #tpu.memory_space<vmem>>, vector<1x2x128xf32>,
    return
  }
  func.func @transform_0(%arg0: i32) -> (i32, i32, i32) {
    %c0_i32 = arith.constant 0 : i32
    %c0_i32_0 = arith.constant 0 : i32
    %c0_i32_1 = arith.constant 0 : i32
    return %arg0, %c0_i32, %c0_i32_0 : i32, i32, i32
  }
  func.func @transform_1(%arg0: i32) -> (i32, i32, i32) {
    %c0_i32 = arith.constant 0 : i32
    %c0_i32_0 = arith.constant 0 : i32
    %c0_i32_1 = arith.constant 0 : i32
    return %arg0, %c0_i32, %c0_i32_0 : i32, i32, i32
  }
  func.func @transform_2(%arg0: i32) -> (i32, i32, i32) {
    %c0_i32 = arith.constant 0 : i32
    %c0_i32_0 = arith.constant 0 : i32
    %c0_i32_1 = arith.constant 0 : i32
    return %arg0, %c0_i32, %c0_i32_0 : i32, i32, i32
  }
  func.func @transform_3(%arg0: i32) -> (i32, i32) {
    %c0_i32 = arith.constant 0 : i32
    %c0_i32_0 = arith.constant 0 : i32
    %c0_i32_1 = arith.constant 0 : i32
    return %c0_i32, %c0_i32_0 : i32, i32
  }
  func.func @transform_4(%arg0: i32) -> (i32, i32) {
    %c0_i32 = arith.constant 0 : i32
    %c0_i32_0 = arith.constant 0 : i32
    %c0_i32_1 = arith.constant 0 : i32
    return %c0_i32, %c0_i32_0 : i32, i32
  }
  func.func @transform_5(%arg0: i32) -> (i32, i32) {
    %c0_i32 = arith.constant 0 : i32
    %c0_i32_0 = arith.constant 0 : i32
    %c0_i32_1 = arith.constant 0 : i32
    return %c0_i32, %c0_i32_0 : i32, i32
  }
  func.func @transform_6(%arg0: i32) -> (i32, i32) {
    %c0_i32 = arith.constant 0 : i32
    %c0_i32_0 = arith.constant 0 : i32
    %c0_i32_1 = arith.constant 0 : i32
    return %c0_i32, %c0_i32_0 : i32, i32
  }
  func.func @transform_7(%arg0: i32) -> (i32, i32) {
    %c0_i32 = arith.constant 0 : i32
    %c0_i32_0 = arith.constant 0 : i32
    %c0_i32_1 = arith.constant 0 : i32
    return %c0_i32, %c0_i32_0 : i32, i32
  }
  func.func @transform_8(%arg0: i32) -> (i32, i32) {
    %c0_i32 = arith.constant 0 : i32
    %c0_i32_0 = arith.constant 0 : i32
    %c0_i32_1 = arith.constant 0 : i32
    return %c0_i32, %c0_i32_0 : i32, i32
  }
  func.func @transform_9(%arg0: i32) -> (i32, i32) {
    %c0_i32 = arith.constant 0 : i32
    %c0_i32_0 = arith.constant 0 : i32
    %c0_i32_1 = arith.constant 0 : i32
    return %c0_i32, %c0_i32_0 : i32, i32
  }
  func.func @transform_10(%arg0: i32) -> (i32, i32) {
    %c0_i32 = arith.constant 0 : i32
    %c0_i32_0 = arith.constant 0 : i32
    %c0_i32_1 = arith.constant 0 : i32
    return %c0_i32, %c0_i32_0 : i32, i32
  }
  func.func @transform_11(%arg0: i32) -> (i32, i32, i32) {
    %c0_i32 = arith.constant 0 : i32
    %c0_i32_0 = arith.constant 0 : i32
    %c0_i32_1 = arith.constant 0 : i32
    %c0_i32_2 = arith.constant 0 : i32
    return %c0_i32, %c0_i32_0, %c0_i32_1 : i32, i32, i32
  }
  func.func @transform_12(%arg0: i32) -> (i32, i32, i32) {
    %c0_i32 = arith.constant 0 : i32
    %c0_i32_0 = arith.constant 0 : i32
    %c0_i32_1 = arith.constant 0 : i32
    %c0_i32_2 = arith.constant 0 : i32
    return %c0_i32, %c0_i32_0, %c0_i32_1 : i32, i32, i32
  }
  func.func @transform_13(%arg0: i32) -> (i32, i32) {
    %c0_i32 = arith.constant 0 : i32
    %c0_i32_0 = arith.constant 0 : i32
    %c0_i32_1 = arith.constant 0 : i32
    return %c0_i32, %c0_i32_0 : i32, i32
  }
  func.func @transform_14(%arg0: i32) -> (i32, i32) {
    %c0_i32 = arith.constant 0 : i32
    %c0_i32_0 = arith.constant 0 : i32
    %c0_i32_1 = arith.constant 0 : i32
    return %c0_i32, %c0_i32_0 : i32, i32
  }
  func.func @transform_15(%arg0: i32) -> (i32, i32) {
    %c0_i32 = arith.constant 0 : i32
    %c0_i32_0 = arith.constant 0 : i32
    %c0_i32_1 = arith.constant 0 : i32
    return %c0_i32, %c0_i32_0 : i32, i32
  }
  func.func @transform_16(%arg0: i32) -> (i32, i32) {
    %c0_i32 = arith.constant 0 : i32
    %c0_i32_0 = arith.constant 0 : i32
    %c0_i32_1 = arith.constant 0 : i32
    return %c0_i32, %c0_i32_0 : i32, i32
  }
  func.func @transform_17(%arg0: i32) -> (i32, i32, i32) {
    %c0_i32 = arith.constant 0 : i32
    %c0_i32_0 = arith.constant 0 : i32
    %c0_i32_1 = arith.constant 0 : i32
    return %arg0, %c0_i32, %c0_i32_0 : i32, i32, i32
  }
}

</mosaic_0001>

<bundles_post_ra>
// kernel: tpu_custom_call.1
= control target key start
LH: loop header
LB: loop body
LE: loop exit
PB: predicated region body
PF: predicated region fallthrough
CT: control target
= control target key end

     0   :  { %s6537_s0 = inlined_call_operand.vmem [shape: f32[1,16,16], index: 0, kind: input, shape index: {}]   ;;  %s6538_s1 = inlined_call_operand.vmem [shape: f32[1,16,16], index: 1, kind: input, shape index: {}]   ;;  %s6539_s2 = inlined_call_operand.vmem [shape: f32[1,16,2], index: 2, kind: input, shape index: {}]   ;;  %s6540_s3 = inlined_call_operand.vmem [shape: f32[16,32], index: 3, kind: input, shape index: {}]   ;;  %s6541_s4 = inlined_call_operand.vmem [shape: f32[32,32], index: 4, kind: input, shape index: {}]   ;;  %s6542_s5 = inlined_call_operand.vmem [shape: f32[32,64], index: 5, kind: input, shape index: {}]   ;;  %s6543_s6 = inlined_call_operand.vmem [shape: f32[64,64], index: 6, kind: input, shape index: {}]   ;;  %s6544_s7 = inlined_call_operand.vmem [shape: f32[64,128], index: 7, kind: input, shape index: {}]   ;;  %s6545_s8 = inlined_call_operand.vmem [shape: f32[128,128], index: 8, kind: input, shape index: {}]   ;;  %s6546_s9 = inlined_call_operand.vmem [shape: f32[128,64], index: 9, kind: input, shape index: {}]   ;;  %s6547_s10 = inlined_call_operand.vmem [shape: f32[64,64], index: 10, kind: input, shape index: {}]   ;;  %s6548_s11 = inlined_call_operand.vmem [shape: f32[8,64,32], index: 11, kind: input, shape index: {}]   ;;  %s6549_s12 = inlined_call_operand.vmem [shape: f32[8,2,32], index: 12, kind: input, shape index: {}]   ;;  %s6550_s13 = inlined_call_operand.vmem [shape: f32[32,1], index: 13, kind: input, shape index: {}]   ;;  %s6551_s14 = inlined_call_operand.vmem [shape: f32[32,128], index: 14, kind: input, shape index: {}]   ;;  %s6552_s15 = inlined_call_operand.vmem [shape: f32[128,128], index: 15, kind: input, shape index: {}]   ;;  %s6553_s16 = inlined_call_operand.vmem [shape: f32[16,128], index: 16, kind: input, shape index: {}]   ;;  %s6554_s17 = inlined_call_operand.hbm [shape: f32[1,2,128], index: 17, kind: output, shape index: {}]  }
   0x1   :  { %6557 = sst [smem:[#allocation5_spill]] %s6537_s0 }
   0x2   :  { %6558 = sst [smem:[#allocation6_spill]] %s6538_s1 }
   0x3   :  { %s6559_s26 = sld [smem:[#allocation5_spill]]  ;;  %s6560_s30 = sld [smem:[#allocation6_spill]]  ;;  %vm71_vm0 = vcmask 130048   ;;  %v65_v4 = vld [vmem:[%s6540_s3] sm:$0xff]  ;;  %v66_v5 = vld [vmem:[%s6540_s3 + $0x8] sm:$0xff] }
   0x4   :  { %v4922_v6 = vpack.c.bf16 %v66_v5, %v65_v4 }
   0x9   :  { %v61_v0 = vld [vmem:[%s6559_s26] sm:$0xff]  ;;  %v62_v1 = vld [vmem:[%s6559_s26 + $0x8] sm:$0xff] }
   0xa   :  { %v5506_v2 = vld [vmem:[%s6560_s30] sm:$0xff]  ;;  %v4918_v3 = vpack.c.bf16 %v62_v1, %v61_v0 }
   0xb   :  { %4410 = vmatprep.mubr.msk.f32.mxu0 %vm71_vm0, %v5506_v2  ;;  %4435 = vmatprep.mubr.msk.f32.mxu1 %vm71_vm0, %v5506_v2 }
   0xc   :  { %22 = vsyncpa [#allocation3], 0  ;;  %4919 = vmatprep.subr.bf16.mxu0 %v4918_v3  ;;  %v5521_v7 = vld [vmem:[%s6560_s30 + $0x8] sm:$0xff]  ;;  %v67_v8 = vld [vmem:[%s6541_s4] sm:$0xff]  ;;  %vm246_vm1 = vcmask 261120   ;;  %vm510_vm2 = vcmask 523264  }
   0xd   :  { %4921 = vmatpush3.bf16.msra.mxu0 %v4918_v3  ;;  %v68_v9 = vld [vmem:[%s6541_s4 + $0x8] sm:$0xff]  ;;  %v69_v13 = vld [vmem:[%s6541_s4 + $0x10] sm:$0xff]  ;;  %v70_v14 = vld [vmem:[%s6541_s4 + $0x18] sm:$0xff]  ;;  %vm5403_vm3 = vmmov 0  }
   0xe   :  { %4923 = vmatprep.subr.bf16.mxu0 %v4922_v6  ;;  %v4926_v10 = vpack.c.bf16 %v68_v9, %v67_v8  ;;  %v4930_v15 = vpack.c.bf16 %v70_v14, %v69_v13  ;;  %v4042_v16 = vld [vmem:[%s6553_s16] ss:$0 sm:$0xff]  ;;  %v331_v24 = vld [vmem:[%s6542_s5 + $0x8] sm:$0xff]  ;;  %v332_v25 = vld [vmem:[%s6542_s5 + $0x10] sm:$0xff] }
   0xf   :  { %v330_v23 = vld [vmem:[%s6542_s5] sm:$0xff]  ;;  %v333_v27 = vld [vmem:[%s6542_s5 + $0x18] sm:$0xff]  ;;  %v335_v38 = vld [vmem:[%s6543_s6 + $0x8] sm:$0xff]  ;;  %s5406_s5 = smov [#allocation2]  }
  0x10   :  { %4411 = vmatmul.mubr.msk.f32.vlgmr.msra.gmra.mrb[0].mxu0 %vm71_vm0, %v5521_v7  ;;  %v4938_v26 = vpack.c.bf16 %v331_v24, %v330_v23  ;;  %v4942_v28 = vpack.c.bf16 %v333_v27, %v332_v25  ;;  %v4045_v29 = vld [vmem:[%s6553_s16 + $0x1] ss:$0 sm:$0xff]  ;;  %v336_v40 = vld [vmem:[%s6543_s6 + $0x10] sm:$0xff]  ;;  %v337_v41 = vld [vmem:[%s6543_s6 + $0x18] sm:$0xff]  ;;  %s4032_s26 = sshll.u32 %s5406_s5, 4  ;;  %s4033_s26 = int_to_ptr.vmem [resolvable:$true] %s4032_s26 }
  0x11   :  { %4925 = vmatpush3.bf16.msra.mxu0 %v4922_v6  ;;  %v334_v37 = vld [vmem:[%s6543_s6] sm:$0xff]  ;;  %v4950_v44 = vpack.c.bf16 %v337_v41, %v336_v40  ;;  %v339_v46 = vld [vmem:[%s6543_s6 + $0x28] sm:$0xff]  ;;  %v340_v48 = vld [vmem:[%s6543_s6 + $0x30] sm:$0xff]  ;;  %p5383_p1 = scmp.lt.s32.totalorder %s4033_s26, %s4033_s26 }
  0x12   :  { %4927 = vmatprep.subr.bf16.mxu0 %v4926_v10  ;;  %v4946_v39 = vpack.c.bf16 %v335_v38, %v334_v37  ;;  %v338_v45 = vld [vmem:[%s6543_s6 + $0x20] sm:$0xff]  ;;  %v341_v49 = vld [vmem:[%s6543_s6 + $0x38] sm:$0xff]  ;;  %v595_v1 = vld [vmem:[%s6544_s7 + $0x8] sm:$0xff] }
  0x13   :  { %v4954_v47 = vpack.c.bf16 %v339_v46, %v338_v45  ;;  %v4958_v50 = vpack.c.bf16 %v341_v49, %v340_v48  ;;  %v4050_v51 = vld [vmem:[%s6553_s16 + $0x2] ss:$0 sm:$0xff]  ;;  %v4053_v58 = vld [vmem:[%s6553_s16 + $0x3] ss:$0 sm:$0xff]  ;;  %v596_v6 = vld [vmem:[%s6544_s7 + $0x10] sm:$0xff] }
  0x14   :  { %v594_v0 = vld [vmem:[%s6544_s7] sm:$0xff]  ;;  %v597_v8 = vld [vmem:[%s6544_s7 + $0x18] sm:$0xff]  ;;  %v600_v13 = vld [vmem:[%s6544_s7 + $0x30] sm:$0xff] }
  0x15   :  { %v4966_v5 = vpack.c.bf16 %v595_v1, %v594_v0  ;;  %v4970_v9 = vpack.c.bf16 %v597_v8, %v596_v6  ;;  %v601_v14 = vld [vmem:[%s6544_s7 + $0x38] sm:$0xff]  ;;  %v607_v23 = vld [vmem:[%s6545_s8 + $0x28] sm:$0xff]  ;;  %v608_v25 = vld [vmem:[%s6545_s8 + $0x30] sm:$0xff] }
  0x16   :  { %v617_v40 = vld [vmem:[%s6545_s8 + $0x78] sm:$0xff]  ;;  %v867_v48 = vld [vmem:[%s6546_s9 + $0x20] sm:$0xff]  ;;  %v868_v49 = vld [vmem:[%s6546_s9 + $0x28] sm:$0xff] }
  0x17   :  { %v866_v46 = vld [vmem:[%s6546_s9 + $0x18] sm:$0xff]  ;;  %v877_v8 = vld [vmem:[%s6546_s9 + $0x70] sm:$0xff]  ;;  %vm6009_vm4 = vmpackc.low %vm246_vm1, %vm246_vm1 }
  0xe3   :  { %v4412_v11 = vpop.f32.mrb[0].mxu0 }
  0xe4   :  { %v144_v12 = vpop.f32.mrb[1].mxu0 }
  0xe5   :  { %4417 = vmatprep.mubr.msk.f32.mxu0 %vm71_vm0, %v144_v12 }
  0xe6   :  { %4418 = vmatmul.mubr.msk.f32.vlgmr.msra.gmra.mrb[2].mxu0 %vm71_vm0, %v4412_v11  ;;  %v599_v11 = vld [vmem:[%s6544_s7 + $0x28] sm:$0xff] }
  0xe7   :  { %4929 = vmatpush3.bf16.msra.mxu0 %v4926_v10  ;;  %v598_v10 = vld [vmem:[%s6544_s7 + $0x20] sm:$0xff] }
  0xe8   :  { %4931 = vmatprep.subr.bf16.mxu0 %v4930_v15  ;;  %v4974_v12 = vpack.c.bf16 %v599_v11, %v598_v10  ;;  %v4061_v11 = vld [vmem:[%s6553_s16 + $0x5] ss:$0 sm:$0xff] }
  0xeb   :  { %4933 = vmatpush3.bf16.msra.mxu0 %v4930_v15  ;;  %v4978_v15 = vpack.c.bf16 %v601_v14, %v600_v13 }
  0xec   :  { %4939 = vmatprep.subr.bf16.mxu0 %v4938_v26 }
 0x1b9   :  { %v4419_v17 = vpop.f32.mrb[2].mxu0 }
 0x1ba   :  { %v236_v18 = vadd.f32 %v4419_v17, %v4042_v16  ;;  %v230_v19 = vpop.f32.mrb[3].mxu0  ;;  %v603_v17 = vld [vmem:[%s6545_s8 + $0x8] sm:$0xff] }
 0x1bb   :  { %v231_v20 = vadd.f32 %v4042_v16, %v230_v19  ;;  %v602_v16 = vld [vmem:[%s6545_s8] sm:$0xff] }
 0x1bc   :  { %v240_v22 = vmax.f32 %v236_v18, 0.0  ;;  %v604_v18 = vld [vmem:[%s6545_s8 + $0x10] sm:$0xff]  ;;  %v4982_v19 = vpack.c.bf16 %v603_v17, %v602_v16  ;;  %v879_v17 = vld [vmem:[%s6547_s10] sm:$0xff] }
 0x1bd   :  { %v239_v21 = vmax.f32 %v231_v20, 0.0  ;;  %v605_v20 = vld [vmem:[%s6545_s8 + $0x18] sm:$0xff] }
 0x1bf   :  { %4428 = vmatprep.mubr.msk.f32.mxu0 %vm246_vm1, %v239_v21  ;;  %v4986_v21 = vpack.c.bf16 %v605_v20, %v604_v18  ;;  %v880_v18 = vld [vmem:[%s6547_s10 + $0x8] sm:$0xff] }
 0x1c0   :  { %4429 = vmatmul.mubr.msk.f32.vlgmr.msra.gmra.mrb[4].mxu0 %vm246_vm1, %v240_v22  ;;  %v606_v22 = vld [vmem:[%s6545_s8 + $0x20] sm:$0xff] }
 0x1c1   :  { %4941 = vmatpush3.bf16.msra.mxu0 %v4938_v26  ;;  %v4990_v24 = vpack.c.bf16 %v607_v23, %v606_v22  ;;  %v609_v26 = vld [vmem:[%s6545_s8 + $0x38] sm:$0xff]  ;;  %v5050_v22 = vpack.c.bf16 %v880_v18, %v879_v17  ;;  %v881_v23 = vld [vmem:[%s6547_s10 + $0x10] sm:$0xff] }
 0x1c2   :  { %4943 = vmatprep.subr.bf16.mxu0 %v4942_v28  ;;  %v4994_v27 = vpack.c.bf16 %v609_v26, %v608_v25  ;;  %v883_v26 = vld [vmem:[%s6547_s10 + $0x20] sm:$0xff] }
 0x1c5   :  { %4945 = vmatpush3.bf16.msra.mxu0 %v4942_v28  ;;  %v610_v28 = vld [vmem:[%s6545_s8 + $0x40] sm:$0xff] }
 0x1c6   :  { %4947 = vmatprep.subr.bf16.mxu0 %v4946_v39 }
 0x293   :  { %v4430_v30 = vpop.f32.mrb[4].mxu0 }
 0x294   :  { %v325_v31 = vadd.f32 %v4430_v30, %v4045_v29  ;;  %v319_v32 = vpop.f32.mrb[5].mxu0 }
 0x295   :  { %v320_v33 = vadd.f32 %v4045_v29, %v319_v32  ;;  %v611_v29 = vld [vmem:[%s6545_s8 + $0x48] sm:$0xff]  ;;  %v613_v32 = vld [vmem:[%s6545_s8 + $0x58] sm:$0xff] }
 0x296   :  { %v329_v34 = vmax.f32 %v325_v31, 0.0  ;;  %v4998_v30 = vpack.c.bf16 %v611_v29, %v610_v28  ;;  %v612_v31 = vld [vmem:[%s6545_s8 + $0x50] sm:$0xff] }
 0x297   :  { %v328_v35 = vmax.f32 %v320_v33, 0.0  ;;  %v5002_v33 = vpack.c.bf16 %v613_v32, %v612_v31  ;;  %v885_v29 = vld [vmem:[%s6547_s10 + $0x30] sm:$0xff]  ;;  %v1133_v32 = vld [vmem:[%s6548_s11 + $0x8] sm:$0xff] }
 0x299   :  { %v4934_v36 = vpack.c.bf16 %v329_v34, %v328_v35  ;;  %v614_v34 = vld [vmem:[%s6545_s8 + $0x60] sm:$0xff]  ;;  %v615_v35 = vld [vmem:[%s6545_s8 + $0x68] sm:$0xff] }
 0x29b   :  { %4935 = vmatprep.subr.bf16.mxu1 %v4934_v36 }
 0x29c   :  { %4937 = vmatpush3.bf16.msra.mxu1 %v4934_v36  ;;  %v5006_v36 = vpack.c.bf16 %v615_v35, %v614_v34  ;;  %v1141_v35 = vld [vmem:[%s6548_s11 + $0x48] sm:$0xff] }
 0x29f   :  { %4436 = vmatmul.mubr.msk.f32.vlgmr.msra.gmra.mrb[0].mxu1 %vm71_vm0, %v5521_v7 }
 0x2a0   :  { %4472 = vmatprep.mubr.msk.f32.mxu1 %vm71_vm0, %v5506_v2 }
 0x372   :  { %v4437_v42 = vpop.f32.mrb[0].mxu1 }
 0x373   :  { %v408_v43 = vpop.f32.mrb[1].mxu1 }
 0x374   :  { %4446 = vmatprep.mubr.msk.f32.mxu0 %vm246_vm1, %v408_v43  ;;  %v864_v43 = vld [vmem:[%s6546_s9 + $0x8] sm:$0xff] }
 0x375   :  { %4447 = vmatmul.mubr.msk.f32.vlgmr.msra.gmra.mrb[6].mxu0 %vm246_vm1, %v4437_v42  ;;  %v863_v42 = vld [vmem:[%s6546_s9] sm:$0xff] }
 0x376   :  { %4949 = vmatpush3.bf16.msra.mxu0 %v4946_v39  ;;  %v616_v39 = vld [vmem:[%s6545_s8 + $0x70] sm:$0xff]  ;;  %v5014_v45 = vpack.c.bf16 %v864_v43, %v863_v42  ;;  %v4062_v43 = vld [vmem:[%s6553_s16 + $0x6] ss:$0 sm:$0xff] }
 0x377   :  { %4951 = vmatprep.subr.bf16.mxu0 %v4950_v44  ;;  %v5010_v41 = vpack.c.bf16 %v617_v40, %v616_v39  ;;  %v1136_v40 = vld [vmem:[%s6548_s11 + $0x20] sm:$0xff] }
 0x37a   :  { %4953 = vmatpush3.bf16.msra.mxu0 %v4950_v44  ;;  %v865_v44 = vld [vmem:[%s6546_s9 + $0x10] sm:$0xff] }
 0x37b   :  { %4955 = vmatprep.subr.bf16.mxu0 %v4954_v47 }
 0x37e   :  { %4957 = vmatpush3.bf16.msra.mxu0 %v4954_v47  ;;  %v5018_v47 = vpack.c.bf16 %v866_v46, %v865_v44 }
 0x37f   :  { %4959 = vmatprep.subr.bf16.mxu0 %v4958_v50 }
 0x382   :  { %4961 = vmatpush3.bf16.msra.mxu0 %v4958_v50  ;;  %v5022_v50 = vpack.c.bf16 %v868_v49, %v867_v48  ;;  %v1142_v48 = vld [vmem:[%s6548_s11 + $0x50] sm:$0xff]  ;;  %v1143_v49 = vld [vmem:[%s6548_s11 + $0x58] sm:$0xff] }
 0x383   :  { %4983 = vmatprep.subr.bf16.mxu0 %v4982_v19 }
 0x448   :  { %v4448_v52 = vpop.f32.mrb[6].mxu0 }
 0x449   :  { %v500_v53 = vadd.f32 %v4448_v52, %v4050_v51  ;;  %v494_v54 = vpop.f32.mrb[7].mxu0  ;;  %v870_v52 = vld [vmem:[%s6546_s9 + $0x38] sm:$0xff] }
 0x44a   :  { %v495_v55 = vadd.f32 %v4050_v51, %v494_v54  ;;  %v869_v51 = vld [vmem:[%s6546_s9 + $0x30] sm:$0xff]  ;;  %v871_v54 = vld [vmem:[%s6546_s9 + $0x40] sm:$0xff] }
 0x44b   :  { %v504_v57 = vmax.f32 %v500_v53, 0.0  ;;  %v5026_v53 = vpack.c.bf16 %v870_v52, %v869_v51  ;;  %v5086_v52 = vpack.c.bf16 %v1143_v49, %v1142_v48  ;;  %v1171_v48 = vld [vmem:[%s6548_s11 + $0x138] sm:$0xff]  ;;  %v1178_v49 = vld [vmem:[%s6548_s11 + $0x170] sm:$0xff] }
 0x44c   :  { %v503_v56 = vmax.f32 %v495_v55, 0.0  ;;  %v872_v55 = vld [vmem:[%s6546_s9 + $0x48] sm:$0xff] }
 0x44e   :  { %4465 = vmatprep.mubr.msk.f32.mxu0 %vm510_vm2, %v503_v56  ;;  %v5030_v56 = vpack.c.bf16 %v872_v55, %v871_v54  ;;  %v1145_v54 = vld [vmem:[%s6548_s11 + $0x68] sm:$0xff] }
 0x44f   :  { %4466 = vmatmul.mubr.msk.f32.vlgmr.msra.gmra.mrb[8].mxu0 %vm510_vm2, %v504_v57  ;;  %v873_v57 = vld [vmem:[%s6546_s9 + $0x50] sm:$0xff] }
 0x450   :  { %4985 = vmatpush3.bf16.msra.mxu0 %v4982_v19 }
 0x451   :  { %4987 = vmatprep.subr.bf16.mxu0 %v4986_v21 }
 0x454   :  { %4989 = vmatpush3.bf16.msra.mxu0 %v4986_v21 }
 0x455   :  { %4991 = vmatprep.subr.bf16.mxu0 %v4990_v24 }
 0x458   :  { %4993 = vmatpush3.bf16.msra.mxu0 %v4990_v24  ;;  %v882_v24 = vld [vmem:[%s6547_s10 + $0x18] sm:$0xff] }
 0x459   :  { %4995 = vmatprep.subr.bf16.mxu0 %v4994_v27  ;;  %v5054_v25 = vpack.c.bf16 %v882_v24, %v881_v23  ;;  %v1154_v24 = vld [vmem:[%s6548_s11 + $0xb0] sm:$0xff] }
 0x45c   :  { %4997 = vmatpush3.bf16.msra.mxu0 %v4994_v27  ;;  %v884_v27 = vld [vmem:[%s6547_s10 + $0x28] sm:$0xff] }
 0x45d   :  { %4999 = vmatprep.subr.bf16.mxu0 %v4998_v30  ;;  %v5058_v28 = vpack.c.bf16 %v884_v27, %v883_v26  ;;  %v1162_v26 = vld [vmem:[%s6548_s11 + $0xf0] sm:$0xff]  ;;  %v1163_v27 = vld [vmem:[%s6548_s11 + $0xf8] sm:$0xff] }
 0x460   :  { %5001 = vmatpush3.bf16.msra.mxu0 %v4998_v30  ;;  %v886_v30 = vld [vmem:[%s6547_s10 + $0x38] sm:$0xff] }
 0x461   :  { %5003 = vmatprep.subr.bf16.mxu0 %v5002_v33  ;;  %v5062_v31 = vpack.c.bf16 %v886_v30, %v885_v29  ;;  %v5126_v29 = vpack.c.bf16 %v1163_v27, %v1162_v26  ;;  %v1164_v30 = vld [vmem:[%s6548_s11 + $0x100] sm:$0xff]  ;;  %v1809_v27 = vld [vmem:[%s6549_s12 + $0xe] sm:$0x1] }
 0x464   :  { %5005 = vmatpush3.bf16.msra.mxu0 %v5002_v33  ;;  %v1140_v33 = vld [vmem:[%s6548_s11 + $0x40] sm:$0xff] }
 0x465   :  { %5007 = vmatprep.subr.bf16.mxu0 %v5006_v36 }
 0x468   :  { %5009 = vmatpush3.bf16.msra.mxu0 %v5006_v36  ;;  %v1134_v36 = vld [vmem:[%s6548_s11 + $0x10] sm:$0xff] }
 0x469   :  { %5011 = vmatprep.subr.bf16.mxu0 %v5010_v41 }
 0x46c   :  { %5013 = vmatpush3.bf16.msra.mxu0 %v5010_v41  ;;  %v1137_v41 = vld [vmem:[%s6548_s11 + $0x28] sm:$0xff] }
 0x46d   :  { %v5074_v42 = vpack.c.bf16 %v1137_v41, %v1136_v40  ;;  %v1168_v41 = vld [vmem:[%s6548_s11 + $0x120] sm:$0xff] }
 0x522   :  { %v4467_v59 = vpop.f32.mrb[8].mxu0 }
 0x523   :  { %v589_v60 = vadd.f32 %v4467_v59, %v4053_v58  ;;  %v583_v61 = vpop.f32.mrb[9].mxu0 }
 0x524   :  { %v584_v62 = vadd.f32 %v4053_v58, %v583_v61  ;;  %v874_v58 = vld [vmem:[%s6546_s9 + $0x58] sm:$0xff]  ;;  %v876_v61 = vld [vmem:[%s6546_s9 + $0x68] sm:$0xff] }
 0x525   :  { %v593_v63 = vmax.f32 %v589_v60, 0.0  ;;  %v5034_v59 = vpack.c.bf16 %v874_v58, %v873_v57  ;;  %v875_v60 = vld [vmem:[%s6546_s9 + $0x60] sm:$0xff]  ;;  %v1139_v57 = vld [vmem:[%s6548_s11 + $0x38] sm:$0xff]  ;;  %v1146_v58 = vld [vmem:[%s6548_s11 + $0x70] sm:$0xff] }
 0x526   :  { %v592_v3 = vmax.f32 %v584_v62, 0.0  ;;  %v5038_v62 = vpack.c.bf16 %v876_v61, %v875_v60  ;;  %v1147_v60 = vld [vmem:[%s6548_s11 + $0x78] sm:$0xff] }
 0x527   :  { %v5094_v61 = vpack.c.bf16 %v1147_v60, %v1146_v58  ;;  %v1183_v60 = vld [vmem:[%s6548_s11 + $0x198] sm:$0xff] }
 0x528   :  { %v4962_v4 = vpack.c.bf16 %v593_v63, %v592_v3  ;;  %v4058_v63 = vld [vmem:[%s6553_s16 + $0x4] ss:$0 sm:$0xff] }
 0x52a   :  { %4963 = vmatprep.subr.bf16.mxu1 %v4962_v4 }
 0x52b   :  { %4965 = vmatpush3.bf16.msra.mxu1 %v4962_v4 }
 0x52c   :  { %4967 = vmatprep.subr.bf16.mxu1 %v4966_v5 }
 0x52e   :  { %4473 = vmatmul.mubr.msk.f32.vlgmr.msra.gmra.mrb[2].mxu1 %vm71_vm0, %v5521_v7 }
 0x52f   :  { %4969 = vmatpush3.bf16.msra.mxu1 %v4966_v5 }
 0x530   :  { %4971 = vmatprep.subr.bf16.mxu1 %v4970_v9 }
 0x533   :  { %4973 = vmatpush3.bf16.msra.mxu1 %v4970_v9  ;;  %v878_v9 = vld [vmem:[%s6546_s9 + $0x78] sm:$0xff] }
 0x534   :  { %4975 = vmatprep.subr.bf16.mxu1 %v4974_v12  ;;  %v5042_v10 = vpack.c.bf16 %v878_v9, %v877_v8 }
 0x537   :  { %4977 = vmatpush3.bf16.msra.mxu1 %v4974_v12 }
 0x538   :  { %4979 = vmatprep.subr.bf16.mxu1 %v4978_v15 }
 0x53b   :  { %4981 = vmatpush3.bf16.msra.mxu1 %v4978_v15 }
 0x53c   :  { %5015 = vmatprep.subr.bf16.mxu1 %v5014_v45 }
 0x601   :  { %v4474_v37 = vpop.f32.mrb[2].mxu1 }
 0x602   :  { %v684_v38 = vpop.f32.mrb[3].mxu1 }
 0x603   :  { %4491 = vmatprep.mubr.msk.f32.mxu1 %vm510_vm2, %v684_v38  ;;  %v5082_v38 = vpack.c.bf16 %v1141_v35, %v1140_v33  ;;  %v1166_v35 = vld [vmem:[%s6548_s11 + $0x110] sm:$0xff] }
 0x604   :  { %4492 = vmatmul.mubr.msk.f32.vlgmr.msra.gmra.mrb[4].mxu1 %vm510_vm2, %v4474_v37  ;;  %v1135_v37 = vld [vmem:[%s6548_s11 + $0x18] sm:$0xff] }
 0x605   :  { %5017 = vmatpush3.bf16.msra.mxu1 %v5014_v45  ;;  %v5070_v39 = vpack.c.bf16 %v1135_v37, %v1134_v36  ;;  %v1167_v36 = vld [vmem:[%s6548_s11 + $0x118] sm:$0xff]  ;;  %v1174_v37 = vld [vmem:[%s6548_s11 + $0x150] sm:$0xff] }
 0x606   :  { %5019 = vmatprep.subr.bf16.mxu1 %v5018_v47 }
 0x609   :  { %5021 = vmatpush3.bf16.msra.mxu1 %v5018_v47 }
 0x60a   :  { %5023 = vmatprep.subr.bf16.mxu1 %v5022_v50 }
 0x60d   :  { %5025 = vmatpush3.bf16.msra.mxu1 %v5022_v50 }
 0x60e   :  { %5027 = vmatprep.subr.bf16.mxu1 %v5026_v53 }
 0x611   :  { %5029 = vmatpush3.bf16.msra.mxu1 %v5026_v53  ;;  %v1144_v53 = vld [vmem:[%s6548_s11 + $0x60] sm:$0xff] }
 0x612   :  { %5031 = vmatprep.subr.bf16.mxu1 %v5030_v56  ;;  %v5090_v55 = vpack.c.bf16 %v1145_v54, %v1144_v53  ;;  %v1180_v53 = vld [vmem:[%s6548_s11 + $0x180] sm:$0xff]  ;;  %v1181_v54 = vld [vmem:[%s6548_s11 + $0x188] sm:$0xff] }
 0x615   :  { %5033 = vmatpush3.bf16.msra.mxu1 %v5030_v56  ;;  %v1138_v56 = vld [vmem:[%s6548_s11 + $0x30] sm:$0xff] }
 0x616   :  { %5035 = vmatprep.subr.bf16.mxu1 %v5034_v59 }
 0x619   :  { %5037 = vmatpush3.bf16.msra.mxu1 %v5034_v59  ;;  %v5078_v59 = vpack.c.bf16 %v1139_v57, %v1138_v56  ;;  %v1189_v56 = vld [vmem:[%s6548_s11 + $0x1c8] sm:$0xff]  ;;  %v5162_v57 = vpack.c.bf16 %v1181_v54, %v1180_v53 }
 0x61a   :  { %5039 = vmatprep.subr.bf16.mxu1 %v5038_v62  ;;  %v4112_v53 = vld [vmem:[%s6549_s12 + $0x9] ss:$0 sm:$0xff] }
 0x61d   :  { %5041 = vmatpush3.bf16.msra.mxu1 %v5038_v62  ;;  %v1148_v62 = vld [vmem:[%s6548_s11 + $0x80] sm:$0xff] }
 0x61e   :  { %5043 = vmatprep.subr.bf16.mxu1 %v5042_v10 }
 0x621   :  { %5045 = vmatpush3.bf16.msra.mxu1 %v5042_v10 }
 0x6d7   :  { %v4493_v0 = vpop.f32.mrb[4].mxu1 }
 0x6d8   :  { %v776_v1 = vadd.f32 %v4493_v0, %v4058_v63  ;;  %v770_v3 = vpop.f32.mrb[5].mxu1  ;;  %v1156_v0 = vld [vmem:[%s6548_s11 + $0xc0] sm:$0xff] }
 0x6d9   :  { %v771_v4 = vadd.f32 %v4058_v63, %v770_v3  ;;  %v1149_v63 = vld [vmem:[%s6548_s11 + $0x88] sm:$0xff] }
 0x6da   :  { %v780_v6 = vmax.f32 %v776_v1, 0.0  ;;  %v5098_v1 = vpack.c.bf16 %v1149_v63, %v1148_v62  ;;  %v1157_v3 = vld [vmem:[%s6548_s11 + $0xc8] sm:$0xff]  ;;  %v1191_v62 = vld [vmem:[%s6548_s11 + $0x1d8] sm:$0xff] }
 0x6db   :  { %v779_v5 = vmax.f32 %v771_v4, 0.0  ;;  %v5114_v4 = vpack.c.bf16 %v1157_v3, %v1156_v0  ;;  %v1184_v0 = vld [vmem:[%s6548_s11 + $0x1a0] sm:$0xff] }
 0x6dd   :  { %4526 = vmatprep.mubr.f32.mxu0 %v779_v5  ;;  %v4065_v5 = vld [vmem:[%s6553_s16 + $0x7] ss:$0 sm:$0xff] }
 0x6de   :  { %4527 = vmatmul.mubr.f32.vlgmr.msra.gmra.mrb[10].mxu0 %v780_v6 }
 0x6df   :  { %4568 = vmatprep.mubr.msk.f32.mxu0 %vm71_vm0, %v5506_v2 }
 0x7b1   :  { %v4528_v12 = vpop.f32.mrb[10].mxu0 }
 0x7b2   :  { %v858_v13 = vadd.f32 %v4528_v12, %v4061_v11  ;;  %v852_v14 = vpop.f32.mrb[11].mxu0  ;;  %v1151_v12 = vld [vmem:[%s6548_s11 + $0x98] sm:$0xff] }
 0x7b3   :  { %v853_v15 = vadd.f32 %v4061_v11, %v852_v14  ;;  %v1150_v11 = vld [vmem:[%s6548_s11 + $0x90] sm:$0xff]  ;;  %v1159_v14 = vld [vmem:[%s6548_s11 + $0xd8] sm:$0xff] }
 0x7b4   :  { %v862_v16 = vmax.f32 %v858_v13, 0.0  ;;  %v1158_v13 = vld [vmem:[%s6548_s11 + $0xd0] sm:$0xff]  ;;  %v5102_v17 = vpack.c.bf16 %v1151_v12, %v1150_v11  ;;  %v1195_v12 = vld [vmem:[%s6548_s11 + $0x1f8] sm:$0xff] }
 0x7b5   :  { %v861_v2 = vmax.f32 %v853_v15, 0.0  ;;  %v5118_v18 = vpack.c.bf16 %v1159_v14, %v1158_v13  ;;  %v1194_v11 = vld [vmem:[%s6548_s11 + $0x1f0] sm:$0xff] }
 0x7b6   :  { %v5190_v14 = vpack.c.bf16 %v1195_v12, %v1194_v11  ;;  %v4115_v11 = vld [vmem:[%s6549_s12 + $0xf] ss:$0 sm:$0xff] }
 0x7b7   :  { %4561 = vmatprep.mubr.f32.mxu1 %v861_v2 }
 0x7b8   :  { %4562 = vmatmul.mubr.f32.vlgmr.msra.gmra.mrb[6].mxu1 %v862_v16  ;;  %v1152_v16 = vld [vmem:[%s6548_s11 + $0xa0] sm:$0xff] }
 0x88b   :  { %v4563_v19 = vpop.f32.mrb[6].mxu1 }
 0x88c   :  { %v953_v20 = vpop.f32.mrb[7].mxu1 }
 0x88d   :  { %v5046_v21 = vpack.c.bf16 %v4563_v19, %v953_v20  ;;  %v1153_v19 = vld [vmem:[%s6548_s11 + $0xa8] sm:$0xff]  ;;  %v1160_v20 = vld [vmem:[%s6548_s11 + $0xe0] sm:$0xff] }
 0x88f   :  { %5047 = vmatprep.subr.bf16.mxu0 %v5046_v21 }
 0x890   :  { %5049 = vmatpush3.bf16.msra.mxu0 %v5046_v21  ;;  %v1161_v21 = vld [vmem:[%s6548_s11 + $0xe8] sm:$0xff] }
 0x891   :  { %5051 = vmatprep.subr.bf16.mxu0 %v5050_v22  ;;  %v5122_v23 = vpack.c.bf16 %v1161_v21, %v1160_v20 }
 0x893   :  { %4569 = vmatmul.mubr.msk.f32.vlgmr.msra.gmra.mrb[12].mxu0 %vm71_vm0, %v5521_v7  ;;  %v1132_v7 = vld [vmem:[%s6548_s11] sm:$0xff] }
 0x894   :  { %5053 = vmatpush3.bf16.msra.mxu0 %v5050_v22  ;;  %v5066_v34 = vpack.c.bf16 %v1133_v32, %v1132_v7  ;;  %v5106_v22 = vpack.c.bf16 %v1153_v19, %v1152_v16  ;;  %v1172_v7 = vld [vmem:[%s6548_s11 + $0x140] sm:$0xff]  ;;  %v1173_v32 = vld [vmem:[%s6548_s11 + $0x148] sm:$0xff]  ;;  %v5404_v16 = vmov 0.0  }
 0x895   :  { %5055 = vmatprep.subr.bf16.mxu0 %v5054_v25 }
 0x896   :  { %5067 = vmatprep.subr.bf16.mxu1 %v5066_v34 }
 0x897   :  { %5069 = vmatpush3.bf16.msra.mxu1 %v5066_v34  ;;  %v5146_v34 = vpack.c.bf16 %v1173_v32, %v1172_v7 }
 0x898   :  { %5057 = vmatpush3.bf16.msra.mxu0 %v5054_v25  ;;  %5071 = vmatprep.subr.bf16.mxu1 %v5070_v39  ;;  %v1155_v25 = vld [vmem:[%s6548_s11 + $0xb8] sm:$0xff] }
 0x899   :  { %5059 = vmatprep.subr.bf16.mxu0 %v5058_v28 }
 0x89b   :  { %5073 = vmatpush3.bf16.msra.mxu1 %v5070_v39  ;;  %v5134_v39 = vpack.c.bf16 %v1167_v36, %v1166_v35 }
 0x89c   :  { %5061 = vmatpush3.bf16.msra.mxu0 %v5058_v28  ;;  %5075 = vmatprep.subr.bf16.mxu1 %v5074_v42  ;;  %v5110_v28 = vpack.c.bf16 %v1155_v25, %v1154_v24 }
 0x89d   :  { %5063 = vmatprep.subr.bf16.mxu0 %v5062_v31 }
 0x89f   :  { %5077 = vmatpush3.bf16.msra.mxu1 %v5074_v42  ;;  %v1169_v42 = vld [vmem:[%s6548_s11 + $0x128] sm:$0xff] }
 0x8a0   :  { %5065 = vmatpush3.bf16.msra.mxu0 %v5062_v31  ;;  %5079 = vmatprep.subr.bf16.mxu1 %v5078_v59  ;;  %v1165_v31 = vld [vmem:[%s6548_s11 + $0x108] sm:$0xff] }
 0x8a1   :  { %5083 = vmatprep.subr.bf16.mxu0 %v5082_v38  ;;  %v5130_v33 = vpack.c.bf16 %v1165_v31, %v1164_v30 }
 0x8a3   :  { %5081 = vmatpush3.bf16.msra.mxu1 %v5078_v59  ;;  %v1182_v59 = vld [vmem:[%s6548_s11 + $0x190] sm:$0xff] }
 0x8a4   :  { %5099 = vmatprep.subr.bf16.mxu1 %v5098_v1  ;;  %v5166_v63 = vpack.c.bf16 %v1183_v60, %v1182_v59 }
 0x966   :  { %v4570_v44 = vpop.f32.mrb[12].mxu0 }
 0x967   :  { %v1039_v45 = vadd.f32 %v4570_v44, %v4062_v43  ;;  %v1033_v46 = vpop.f32.mrb[13].mxu0  ;;  %v1177_v44 = vld [vmem:[%s6548_s11 + $0x168] sm:$0xff] }
 0x968   :  { %v1034_v47 = vadd.f32 %v4062_v43, %v1033_v46  ;;  %v1176_v43 = vld [vmem:[%s6548_s11 + $0x160] sm:$0xff] }
 0x969   :  { %v1043_v51 = vmax.f32 %v1039_v45, 0.0  ;;  %v5138_v45 = vpack.c.bf16 %v1169_v42, %v1168_v41  ;;  %v5154_v46 = vpack.c.bf16 %v1177_v44, %v1176_v43  ;;  %v1803_v44 = vld [vmem:[%s6549_s12 + $0x2] sm:$0x1] }
 0x96a   :  { %v1042_v50 = vmax.f32 %v1034_v47, 0.0  ;;  %v1170_v47 = vld [vmem:[%s6548_s11 + $0x130] sm:$0xff] }
 0x96c   :  { %4587 = vmatprep.mubr.msk.f32.mxu0 %vm510_vm2, %v1042_v50  ;;  %v1179_v50 = vld [vmem:[%s6548_s11 + $0x178] sm:$0xff] }
 0x96d   :  { %4588 = vmatmul.mubr.msk.f32.vlgmr.msra.gmra.mrb[14].mxu0 %vm510_vm2, %v1043_v51  ;;  %v5142_v51 = vpack.c.bf16 %v1171_v48, %v1170_v47 }
 0x96e   :  { %5085 = vmatpush3.bf16.msra.mxu0 %v5082_v38  ;;  %v1175_v38 = vld [vmem:[%s6548_s11 + $0x158] sm:$0xff] }
 0x96f   :  { %5087 = vmatprep.subr.bf16.mxu0 %v5086_v52  ;;  %v5150_v40 = vpack.c.bf16 %v1175_v38, %v1174_v37  ;;  %v4111_v37 = vld [vmem:[%s6549_s12 + $0x7] ss:$0 sm:$0xff] }
 0x972   :  { %5089 = vmatpush3.bf16.msra.mxu0 %v5086_v52  ;;  %v5158_v52 = vpack.c.bf16 %v1179_v50, %v1178_v49 }
 0x973   :  { %5091 = vmatprep.subr.bf16.mxu0 %v5090_v55 }
 0x976   :  { %5093 = vmatpush3.bf16.msra.mxu0 %v5090_v55  ;;  %v1188_v55 = vld [vmem:[%s6548_s11 + $0x1c0] sm:$0xff] }
 0x977   :  { %5095 = vmatprep.subr.bf16.mxu0 %v5094_v61  ;;  %v5178_v58 = vpack.c.bf16 %v1189_v56, %v1188_v55  ;;  %v4113_v55 = vld [vmem:[%s6549_s12 + $0xb] ss:$0 sm:$0xff] }
 0x97a   :  { %5097 = vmatpush3.bf16.msra.mxu0 %v5094_v61  ;;  %v1190_v61 = vld [vmem:[%s6548_s11 + $0x1d0] sm:$0xff] }
 0x97b   :  { %5115 = vmatprep.subr.bf16.mxu0 %v5114_v4  ;;  %v5182_v3 = vpack.c.bf16 %v1191_v62, %v1190_v61 }
 0xa40   :  { %v4589_v6 = vpop.f32.mrb[14].mxu0 }
 0xa41   :  { %v1127_v8 = vadd.f32 %v4589_v6, %v4065_v5  ;;  %v1121_v9 = vpop.f32.mrb[15].mxu0 }
 0xa42   :  { %v1122_v10 = vadd.f32 %v4065_v5, %v1121_v9  ;;  %v1193_v5 = vld [vmem:[%s6548_s11 + $0x1e8] sm:$0xff]  ;;  %v1186_v9 = vld [vmem:[%s6548_s11 + $0x1b0] sm:$0xff] }
 0xa43   :  { %v5837_v2 = vmax.f32 %v1127_v8, 0.0 }
 0xa44   :  { %v5835_v15 = vmax.f32 %v1122_v10, 0.0  ;;  %v1187_v10 = vld [vmem:[%s6548_s11 + $0x1b8] sm:$0xff] }
 0xa45   :  { %v5174_v13 = vpack.c.bf16 %v1187_v10, %v1186_v9  ;;  %v4114_v9 = vld [vmem:[%s6549_s12 + $0xd] ss:$0 sm:$0xff] }
 0xa46   :  { %4606 = vmatprep.mubr.msk.f32.mxu1 %vm510_vm2, %v5835_v15  ;;  %4625 = vmatprep.mubr.msk.f32.mxu0 %vm510_vm2, %v5835_v15 }
 0xa47   :  { %4607 = vmatmul.mubr.msk.f32.vlgmr.msra.gmra.mrb[8].mxu1 %vm510_vm2, %v5837_v2  ;;  %4626 = vmatmul.mubr.msk.f32.vlgmr.msra.gmra.mrb[16].mxu0 %vm510_vm2, %v5837_v2 }
 0xa48   :  { %5101 = vmatpush3.bf16.msra.mxu1 %v5098_v1  ;;  %5117 = vmatpush3.bf16.msra.mxu0 %v5114_v4  ;;  %v1185_v1 = vld [vmem:[%s6548_s11 + $0x1a8] sm:$0xff]  ;;  %v1192_v4 = vld [vmem:[%s6548_s11 + $0x1e0] sm:$0xff] }
 0xa49   :  { %4644 = vmatprep.mubr.msk.f32.mxu1 %vm510_vm2, %v5835_v15  ;;  %4663 = vmatprep.mubr.msk.f32.mxu0 %vm510_vm2, %v5835_v15  ;;  %v5170_v6 = vpack.c.bf16 %v1185_v1, %v1184_v0  ;;  %v5186_v8 = vpack.c.bf16 %v1193_v5, %v1192_v4 }
 0xa4a   :  { %5103 = vmatprep.subr.bf16.mxu1 %v5102_v17  ;;  %5119 = vmatprep.subr.bf16.mxu0 %v5118_v18 }
 0xa4c   :  { %5105 = vmatpush3.bf16.msra.mxu1 %v5102_v17  ;;  %5121 = vmatpush3.bf16.msra.mxu0 %v5118_v18  ;;  %v5405_v17 = vmov 0   ;;  %v4109_v18 = vld [vmem:[%s6549_s12 + $0x3] ss:$0 sm:$0xff] }
 0xa4d   :  { %5107 = vmatprep.subr.bf16.mxu1 %v5106_v22  ;;  %5123 = vmatprep.subr.bf16.mxu0 %v5122_v23 }
 0xa4e   :  { %5305 = vset.pattern.permute.xlu1 %v5405_v17  ;;  %5304 = vset.pattern.permute.xlu0 %v5405_v17 }
 0xa50   :  { %5109 = vmatpush3.bf16.msra.mxu1 %v5106_v22  ;;  %5125 = vmatpush3.bf16.msra.mxu0 %v5122_v23 }
 0xa51   :  { %5111 = vmatprep.subr.bf16.mxu1 %v5110_v28  ;;  %5127 = vmatprep.subr.bf16.mxu0 %v5126_v29 }
 0xa54   :  { %5113 = vmatpush3.bf16.msra.mxu1 %v5110_v28  ;;  %5129 = vmatpush3.bf16.msra.mxu0 %v5126_v29 }
 0xa55   :  { %5131 = vmatprep.subr.bf16.mxu1 %v5130_v33  ;;  %5147 = vmatprep.subr.bf16.mxu0 %v5146_v34 }
 0xa57   :  { %4645 = vmatmul.mubr.msk.f32.vlgmr.msra.gmra.mrb[10].mxu1 %vm510_vm2, %v5837_v2  ;;  %4664 = vmatmul.mubr.msk.f32.vlgmr.msra.gmra.mrb[18].mxu0 %vm510_vm2, %v5837_v2 }
 0xa58   :  { %5133 = vmatpush3.bf16.msra.mxu1 %v5130_v33  ;;  %4682 = vmatprep.mubr.msk.f32.mxu1 %vm510_vm2, %v5835_v15  ;;  %v1802_v33 = vld [vmem:[%s6549_s12] sm:$0x1] }
 0xa59   :  { %5149 = vmatpush3.bf16.msra.mxu0 %v5146_v34  ;;  %4701 = vmatprep.mubr.msk.f32.mxu0 %vm510_vm2, %v5835_v15  ;;  %v4110_v34 = vld [vmem:[%s6549_s12 + $0x5] ss:$0 sm:$0xff] }
 0xa5a   :  { %5135 = vmatprep.subr.bf16.mxu1 %v5134_v39  ;;  %5151 = vmatprep.subr.bf16.mxu0 %v5150_v40 }
 0xa5c   :  { %5137 = vmatpush3.bf16.msra.mxu1 %v5134_v39 }
 0xa5d   :  { %5153 = vmatpush3.bf16.msra.mxu0 %v5150_v40  ;;  %5139 = vmatprep.subr.bf16.mxu1 %v5138_v45 }
 0xa5e   :  { %5155 = vmatprep.subr.bf16.mxu0 %v5154_v46 }
 0xa60   :  { %5141 = vmatpush3.bf16.msra.mxu1 %v5138_v45 }
 0xa61   :  { %5157 = vmatpush3.bf16.msra.mxu0 %v5154_v46  ;;  %5143 = vmatprep.subr.bf16.mxu1 %v5142_v51 }
 0xa62   :  { %5159 = vmatprep.subr.bf16.mxu0 %v5158_v52 }
 0xa64   :  { %5145 = vmatpush3.bf16.msra.mxu1 %v5142_v51  ;;  %v1804_v51 = vld [vmem:[%s6549_s12 + $0x4] sm:$0x1] }
 0xa65   :  { %5161 = vmatpush3.bf16.msra.mxu0 %v5158_v52  ;;  %5163 = vmatprep.subr.bf16.mxu1 %v5162_v57  ;;  %v1805_v52 = vld [vmem:[%s6549_s12 + $0x6] sm:$0x1] }
 0xa66   :  { %5179 = vmatprep.subr.bf16.mxu0 %v5178_v58 }
 0xa67   :  { %4683 = vmatmul.mubr.msk.f32.vlgmr.msra.gmra.mrb[12].mxu1 %vm510_vm2, %v5837_v2 }
 0xa68   :  { %4702 = vmatmul.mubr.msk.f32.vlgmr.msra.gmra.mrb[20].mxu0 %vm510_vm2, %v5837_v2  ;;  %5165 = vmatpush3.bf16.msra.mxu1 %v5162_v57 }
 0xa69   :  { %4720 = vmatprep.mubr.msk.f32.mxu1 %vm510_vm2, %v5835_v15  ;;  %5181 = vmatpush3.bf16.msra.mxu0 %v5178_v58 }
 0xa6a   :  { %4739 = vmatprep.mubr.msk.f32.mxu0 %vm510_vm2, %v5835_v15  ;;  %5167 = vmatprep.subr.bf16.mxu1 %v5166_v63  ;;  %v5402_v15 = vmov 0.0|0.0  }
 0xa6b   :  { %5183 = vmatprep.subr.bf16.mxu0 %v5182_v3 }
 0xa6c   :  { %5169 = vmatpush3.bf16.msra.mxu1 %v5166_v63 }
 0xa6d   :  { %5185 = vmatpush3.bf16.msra.mxu0 %v5182_v3  ;;  %5171 = vmatprep.subr.bf16.mxu1 %v5170_v6 }
 0xa6e   :  { %5187 = vmatprep.subr.bf16.mxu0 %v5186_v8 }
 0xa70   :  { %5173 = vmatpush3.bf16.msra.mxu1 %v5170_v6  ;;  %v1806_v6 = vld [vmem:[%s6549_s12 + $0x8] sm:$0x1] }
 0xa71   :  { %5189 = vmatpush3.bf16.msra.mxu0 %v5186_v8  ;;  %5175 = vmatprep.subr.bf16.mxu1 %v5174_v13  ;;  %v1807_v8 = vld [vmem:[%s6549_s12 + $0xa] sm:$0x1] }
 0xa72   :  { %5191 = vmatprep.subr.bf16.mxu0 %v5190_v14 }
 0xa74   :  { %5177 = vmatpush3.bf16.msra.mxu1 %v5174_v13 }
 0xa75   :  { %5193 = vmatpush3.bf16.msra.mxu0 %v5190_v14  ;;  %5194 = vmatprep.subr.bf16.mxu1 %v5402_v15 }
 0xa76   :  { %5202 = vmatprep.subr.bf16.mxu0 %v5402_v15 }
 0xa77   :  { %4721 = vmatmul.mubr.msk.f32.vlgmr.msra.gmra.mrb[14].mxu1 %vm510_vm2, %v5837_v2 }
 0xa78   :  { %4740 = vmatmul.mubr.msk.f32.vlgmr.msra.gmra.mrb[22].mxu0 %vm510_vm2, %v5837_v2  ;;  %4746 = vmatprep.mubr.msk.f32.mxu1 %vm5403_vm3, %v5404_v16  ;;  %v4108_v2 = vld [vmem:[%s6549_s12 + $0x1] ss:$0 sm:$0xff] }
 0xa79   :  { %4760 = vmatprep.mubr.msk.f32.mxu0 %vm5403_vm3, %v5404_v16 }
 0xb1a   :  { %v4608_v19 = vpop.f32.mrb[8].mxu1  ;;  %v4627_v20 = vpop.f32.mrb[16].mxu0 }
 0xb1b   :  { %v1268_v21 = vpop.f32.mrb[9].mxu1  ;;  %v1343_v22 = vpop.f32.mrb[17].mxu0  ;;  %v2467_v23 = vmul.f32 %v4627_v20, %v4109_v18  ;;  %v2455_v24 = vmul.f32 %v4608_v19, %v4108_v2 }
 0xb1c   :  { %v6003_v25 = vpack.c.bf16 %v4608_v19, %v1268_v21  ;;  %v6005_v26 = vpack.c.bf16 %v4627_v20, %v1343_v22  ;;  %v2454_v28 = vmul.f32 %v4108_v2, %v1268_v21  ;;  %v2466_v29 = vmul.f32 %v4109_v18, %v1343_v22 }
 0xb1d   :  { %v2471_v30 = vsel %vm246_vm1, %v2467_v23, 0.0  ;;  %v2459_v31 = vsel %vm246_vm1, %v2455_v24, 0.0 }
 0xb1e   :  { %2472 = vadd.xlane.f32.xlu1 %v2471_v30  ;;  %2460 = vadd.xlane.f32.xlu0 %v2459_v31  ;;  %v2468_v7 = vsel %vm246_vm1, %v2466_v29, 0.0  ;;  %v2456_v32 = vsel %vm246_vm1, %v2454_v28, 0.0  ;;  %v1808_v29 = vld [vmem:[%s6549_s12 + $0xc] sm:$0x1] }
 0xb1f   :  { %5197 = vmatpush3.bf16.xpose.msk.msra.mxu1 %vm6009_vm4, %v6003_v25 }
 0xb20   :  { %5198 = vmatprep.subr.bf16.mxu1 %v5402_v15 }
 0xb22   :  { %2469 = vadd.xlane.f32.xlu1 %v2468_v7  ;;  %2457 = vadd.xlane.f32.xlu0 %v2456_v32 }
 0xb26   :  { %4747 = vmatmul.mubr.msk.f32.vlgmr.msra.gmra.mrb[16].mxu1 %vm246_vm1, %v1802_v33 }
 0xb27   :  { %5201 = vmatpush3.bf16.xpose.msk.msra.mxu1 %vm6009_vm4, %v6005_v26  ;;  %4753 = vmatprep.mubr.msk.f32.mxu1 %vm5403_vm3, %v5404_v16 }
 0xb28   :  { %5206 = vmatprep.subr.bf16.mxu1 %v5402_v15 }
 0xb2a   :  { %v4646_v35 = vpop.f32.mrb[10].mxu1  ;;  %v4665_v36 = vpop.f32.mrb[18].mxu0 }
 0xb2b   :  { %v2479_v38 = vmul.f32 %v4646_v35, %v4110_v34  ;;  %v1418_v39 = vpop.f32.mrb[11].mxu1  ;;  %v1493_v40 = vpop.f32.mrb[19].mxu0  ;;  %v2491_v45 = vmul.f32 %v4665_v36, %v4111_v37 }
 0xb2c   :  { %v6037_v41 = vpack.c.bf16 %v4646_v35, %v1418_v39  ;;  %v2478_v42 = vmul.f32 %v4110_v34, %v1418_v39  ;;  %v6039_v43 = vpack.c.bf16 %v4665_v36, %v1493_v40  ;;  %v2490_v47 = vmul.f32 %v4111_v37, %v1493_v40 }
 0xb2d   :  { %v2483_v46 = vsel %vm246_vm1, %v2479_v38, 0.0  ;;  %v2495_v49 = vsel %vm246_vm1, %v2491_v45, 0.0 }
 0xb2e   :  { %2484 = vadd.xlane.f32.xlu1 %v2483_v46  ;;  %5205 = vmatpush3.bf16.xpose.msk.msra.mxu0 %vm6009_vm4, %v6037_v41  ;;  %v2480_v48 = vsel %vm246_vm1, %v2478_v42, 0.0  ;;  %v2492_v50 = vsel %vm246_vm1, %v2490_v47, 0.0 }
 0xb2f   :  { %4754 = vmatmul.mubr.msk.f32.vlgmr.msra.gmra.mrb[18].mxu1 %vm246_vm1, %v1803_v44  ;;  %2481 = vadd.xlane.f32.xlu0 %v2480_v48 }
 0xb30   :  { %5209 = vmatpush3.bf16.xpose.msk.msra.mxu1 %vm6009_vm4, %v6039_v43  ;;  %4767 = vmatprep.mubr.msk.f32.mxu1 %vm5403_vm3, %v5404_v16 }
 0xb31   :  { %5210 = vmatprep.subr.bf16.mxu0 %v5402_v15  ;;  %5214 = vmatprep.subr.bf16.mxu1 %v5402_v15 }
 0xb32   :  { %2496 = vadd.xlane.f32.xlu1 %v2495_v49 }
 0xb33   :  { %2493 = vadd.xlane.f32.xlu0 %v2492_v50 }
 0xb35   :  { %4761 = vmatmul.mubr.msk.f32.vlgmr.msra.gmra.mrb[24].mxu0 %vm246_vm1, %v1804_v51 }
 0xb36   :  { %4774 = vmatprep.mubr.msk.f32.mxu0 %vm5403_vm3, %v5404_v16 }
 0xb37   :  { %4768 = vmatmul.mubr.msk.f32.vlgmr.msra.gmra.mrb[20].mxu1 %vm246_vm1, %v1805_v52 }
 0xb38   :  { %4781 = vmatprep.mubr.msk.f32.mxu1 %vm5403_vm3, %v5404_v16 }
 0xb3a   :  { %v4684_v54 = vpop.f32.mrb[12].mxu1 }
 0xb3b   :  { %v2503_v56 = vmul.f32 %v4684_v54, %v4112_v53  ;;  %v4703_v57 = vpop.f32.mrb[20].mxu0  ;;  %v1568_v58 = vpop.f32.mrb[13].mxu1 }
 0xb3c   :  { %v6077_v59 = vpack.c.bf16 %v4684_v54, %v1568_v58  ;;  %v2502_v60 = vmul.f32 %v4112_v53, %v1568_v58  ;;  %v1643_v61 = vpop.f32.mrb[21].mxu0  ;;  %v2515_v62 = vmul.f32 %v4703_v57, %v4113_v55 }
 0xb3d   :  { %v6079_v63 = vpack.c.bf16 %v4703_v57, %v1643_v61  ;;  %v2507_v0 = vsel %vm246_vm1, %v2503_v56, 0.0  ;;  %v2514_v1 = vmul.f32 %v4113_v55, %v1643_v61  ;;  %v2626_v57 = vlaneseq }
 0xb3e   :  { %2508 = vadd.xlane.f32.xlu1 %v2507_v0  ;;  %5213 = vmatpush3.bf16.xpose.msk.msra.mxu0 %vm6009_vm4, %v6077_v59  ;;  %v2504_v3 = vsel %vm246_vm1, %v2502_v60, 0.0  ;;  %v2519_v4 = vsel %vm246_vm1, %v2515_v62, 0.0 }
 0xb3f   :  { %5217 = vmatpush3.bf16.xpose.msk.msra.mxu1 %vm6009_vm4, %v6079_v63  ;;  %2505 = vadd.xlane.f32.xlu0 %v2504_v3  ;;  %v2516_v5 = vsel %vm246_vm1, %v2514_v1, 0.0  ;;  %v2627_v58 = vshrl.u32 %v2626_v57, 7 }
 0xb40   :  { %5218 = vmatprep.subr.bf16.mxu0 %v5402_v15  ;;  %5222 = vmatprep.subr.bf16.mxu1 %v5402_v15 }
 0xb41   :  { %v6143_v60 = vsub.s32 0, %v2627_v58 }
 0xb42   :  { %2520 = vadd.xlane.f32.xlu1 %v2519_v4 }
 0xb43   :  { %2517 = vadd.xlane.f32.xlu0 %v2516_v5 }
 0xb45   :  { %4775 = vmatmul.mubr.msk.f32.vlgmr.msra.gmra.mrb[26].mxu0 %vm246_vm1, %v1806_v6 }
 0xb46   :  { %4782 = vmatmul.mubr.msk.f32.vlgmr.msra.gmra.mrb[22].mxu1 %vm246_vm1, %v1807_v8  ;;  %4788 = vmatprep.mubr.msk.f32.mxu0 %vm5403_vm3, %v5404_v16  ;;  %v6154_v8 = vld [vmem:[%s6560_s30 + $0x8] sm:$0xff] }
 0xb47   :  { %4795 = vmatprep.mubr.msk.f32.mxu1 %vm5403_vm3, %v5404_v16  ;;  %vm60_vm5 = vcmp.gt.f32.partialorder %v6154_v8, 0.0 }
 0xb4a   :  { %v4722_v10 = vpop.f32.mrb[14].mxu1 }
 0xb4b   :  { %v2527_v12 = vmul.f32 %v4722_v10, %v4114_v9  ;;  %v4741_v13 = vpop.f32.mrb[22].mxu0  ;;  %v1718_v14 = vpop.f32.mrb[15].mxu1 }
 0xb4c   :  { %v6111_v17 = vpack.c.bf16 %v4722_v10, %v1718_v14  ;;  %v2526_v2 = vmul.f32 %v4114_v9, %v1718_v14  ;;  %v1793_v18 = vpop.f32.mrb[23].mxu0  ;;  %v2539_v19 = vmul.f32 %v4741_v13, %v4115_v11 }
 0xb4d   :  { %v6113_v20 = vpack.c.bf16 %v4741_v13, %v1793_v18  ;;  %v2531_v21 = vsel %vm246_vm1, %v2527_v12, 0.0  ;;  %v2538_v22 = vmul.f32 %v4115_v11, %v1793_v18 }
 0xb4e   :  { %2532 = vadd.xlane.f32.xlu1 %v2531_v21  ;;  %5221 = vmatpush3.bf16.xpose.msk.msra.mxu0 %vm6009_vm4, %v6111_v17  ;;  %v2528_v23 = vsel %vm246_vm1, %v2526_v2, 0.0  ;;  %v2543_v24 = vsel %vm246_vm1, %v2539_v19, 0.0 }
 0xb4f   :  { %5225 = vmatpush3.bf16.xpose.msk.msra.mxu1 %vm6009_vm4, %v6113_v20  ;;  %2529 = vadd.xlane.f32.xlu0 %v2528_v23  ;;  %v2540_v28 = vsel %vm246_vm1, %v2538_v22, 0.0  ;;  %v6166_v23 = vld [vmem:[%s6560_s30] sm:$0xff] }
 0xb50   :  { %5235 = vmatprep.subr.bf16.mxu1 %v6037_v41  ;;  %5227 = vmatprep.subr.bf16.mxu0 %v6003_v25  ;;  %vm59_vm9 = vcmp.gt.f32.partialorder %v6166_v23, 0.0 }
 0xb52   :  { %2544 = vadd.xlane.f32.xlu1 %v2543_v24 }
 0xb53   :  { %2541 = vadd.xlane.f32.xlu0 %v2540_v28 }
 0xb55   :  { %4789 = vmatmul.mubr.msk.f32.vlgmr.msra.gmra.mrb[28].mxu0 %vm246_vm1, %v1808_v29 }
 0xb56   :  { %4796 = vmatmul.mubr.msk.f32.vlgmr.msra.gmra.mrb[24].mxu1 %vm246_vm1, %v1809_v27  ;;  %5229 = vmatpush3.bf16.msra.mxu0 %v6003_v25 }
 0xb57   :  { %5237 = vmatpush3.bf16.msra.mxu1 %v6037_v41  ;;  %5231 = vmatprep.subr.bf16.mxu0 %v6005_v26 }
 0xb58   :  { %5243 = vmatprep.subr.bf16.mxu1 %v6077_v59 }
 0xbab   :  { %v2461_v30 = vpop.xlane.xlu0 %2460  ;;  %v2473_v31 = vpop.xlane.xlu1 %2472 }
 0xbac   :  { %2553 = vperm.xlu1 %5305, %v2461_v30  }
 0xbaf   :  { %v2458_v7 = vpop.xlane.xlu0 %2457  ;;  %v2470_v32 = vpop.xlane.xlu1 %2469 }
 0xbb0   :  { %2563 = vperm.xlu1 %5305, %v2473_v31   ;;  %2548 = vperm.xlu0 %5304, %v2458_v7  }
 0xbb4   :  { %2558 = vperm.xlu1 %5305, %v2470_v32  }
 0xbbb   :  { %v2485_v33 = vpop.xlane.xlu1 %2484 }
 0xbbc   :  { %2573 = vperm.xlu1 %5305, %v2485_v33   ;;  %v2482_v35 = vpop.xlane.xlu0 %2481 }
 0xbbf   :  { %v2497_v34 = vpop.xlane.xlu1 %2496 }
 0xbc0   :  { %2583 = vperm.xlu1 %5305, %v2497_v34   ;;  %v2494_v25 = vpop.xlane.xlu0 %2493 }
 0xbc4   :  { %2568 = vperm.xlu1 %5305, %v2482_v35  }
 0xbc8   :  { %2578 = vperm.xlu1 %5305, %v2494_v25  }
 0xbcb   :  { %v2509_v36 = vpop.xlane.xlu1 %2508 }
 0xbcc   :  { %v2506_v37 = vpop.xlane.xlu0 %2505  ;;  %2593 = vperm.xlu0 %5304, %v2509_v36  }
 0xbcd   :  { %2588 = vperm.xlu1 %5305, %v2506_v37  }
 0xbcf   :  { %v2521_v38 = vpop.xlane.xlu1 %2520 }
 0xbd0   :  { %v2518_v39 = vpop.xlane.xlu0 %2517  ;;  %2603 = vperm.xlu0 %5304, %v2521_v38  }
 0xbd1   :  { %2598 = vperm.xlu1 %5305, %v2518_v39  }
 0xbdb   :  { %v2533_v40 = vpop.xlane.xlu1 %2532 }
 0xbdc   :  { %2613 = vperm.xlu0 %5304, %v2533_v40   ;;  %v2530_v41 = vpop.xlane.xlu0 %2529 }
 0xbdd   :  { %2608 = vperm.xlu1 %5305, %v2530_v41  }
 0xbdf   :  { %v2545_v42 = vpop.xlane.xlu1 %2544 }
 0xbe0   :  { %2623 = vperm.xlu0 %5304, %v2545_v42   ;;  %v2542_v44 = vpop.xlane.xlu0 %2541 }
 0xbe1   :  { %2618 = vperm.xlu1 %5305, %v2542_v44  }
 0xbf9   :  { %v1893_v45 = vpop.f32.mrb[16].mxu1 }
 0xbfa   :  { %v4748_v46 = vpop.f32.mrb[17].mxu1  ;;  %v2629_v61 = vrot.slane %v1893_v45, %v6143_v60 }
 0xc02   :  { %v1972_v47 = vpop.f32.mrb[18].mxu1 }
 0xc03   :  { %v4755_v48 = vpop.f32.mrb[19].mxu1  ;;  %v2633_v6 = vrot.slane %v1972_v47, %v6143_v60 }
 0xc08   :  { %v2051_v49 = vpop.f32.mrb[24].mxu0 }
 0xc09   :  { %v4762_v50 = vpop.f32.mrb[25].mxu0  ;;  %v2637_v32 = vrot.slane %v2051_v49, %v6143_v60 }
 0xc0a   :  { %v2130_v51 = vpop.f32.mrb[20].mxu1 }
 0xc0b   :  { %v4769_v52 = vpop.f32.mrb[21].mxu1  ;;  %v2641_v38 = vrot.slane %v2130_v51, %v6143_v60 }
 0xc18   :  { %v6139_v53 = vpop.f32.mrb[26].mxu0 }
 0xc19   :  { %v6141_v54 = vpop.f32.mrb[22].mxu1  ;;  %v4776_v55 = vpop.f32.mrb[27].mxu0  ;;  %v2645_v57 = vrot.slane %v6139_v53, %v6143_v60 }
 0xc1a   :  { %v4783_v56 = vpop.f32.mrb[23].mxu1 }
 0xc28   :  { %v6146_v62 = vpop.f32.mrb[28].mxu0 }
 0xc29   :  { %v4790_v0 = vpop.f32.mrb[29].mxu0  ;;  %v6148_v1 = vpop.f32.mrb[24].mxu1 }
 0xc2a   :  { %v4797_v3 = vpop.f32.mrb[25].mxu1 }
 0xc2b   :  { %v2554_v4 = vpop.permute.xlu1 %2553 }
 0xc2c   :  { %v2659_v5 = vadd.f32 %v2629_v61, %v2554_v4 }
 0xc2e   :  { %v2691_v9 = vmul.f32 0.2, %v2659_v5  ;;  %vm2675_vm6 = vcmp.gt.f32.partialorder %v2659_v5, 0.0 }
 0xc2f   :  { %v2564_v10 = vpop.permute.xlu1 %2563  ;;  %v2549_v11 = vpop.permute.xlu0 %2548 }
 0xc30   :  { %v2661_v12 = vadd.f32 %v2633_v6, %v2564_v10  ;;  %v2658_v13 = vadd.f32 %v2629_v61, %v2549_v11  ;;  %v2707_v14 = vsel %vm2675_vm6, %v2659_v5, %v2691_v9  ;;  %v2649_v9 = vrot.slane %v6141_v54, %v6143_v60 }
 0xc31   :  { %v6159_v2 = vsel %vm60_vm5, %v2707_v14, -1e+09 }
 0xc32   :  { %v2693_v18 = vmul.f32 0.2, %v2661_v12  ;;  %v2690_v19 = vmul.f32 0.2, %v2658_v13  ;;  %v2745_v21 = vsel %vm71_vm0, %v6159_v2, -inf  ;;  %vm2677_vm7 = vcmp.gt.f32.partialorder %v2661_v12, 0.0 }
 0xc33   :  { %v2559_v22 = vpop.permute.xlu1 %2558  ;;  %2746 = vmax.xlane.f32.xlu0 %v2745_v21  ;;  %vm2674_vm8 = vcmp.gt.f32.partialorder %v2658_v13, 0.0 }
 0xc34   :  { %v2660_v24 = vadd.f32 %v2633_v6, %v2559_v22  ;;  %v2709_v28 = vsel %vm2677_vm7, %v2661_v12, %v2693_v18  ;;  %v2706_v29 = vsel %vm2674_vm8, %v2658_v13, %v2690_v19 }
 0xc35   :  { %v6171_v27 = vsel %vm60_vm5, %v2709_v28, -1e+09  ;;  %v6177_v7 = vsel %vm59_vm9, %v2706_v29, -1e+09 }
 0xc36   :  { %v2692_v30 = vmul.f32 0.2, %v2660_v24  ;;  %v2751_v31 = vsel %vm71_vm0, %v6171_v27, -inf  ;;  %vm2676_vm10 = vcmp.gt.f32.partialorder %v2660_v24, 0.0  ;;  %v2742_v25 = vsel %vm71_vm0, %v6177_v7, -inf }
 0xc37   :  { %2752 = vmax.xlane.f32.xlu1 %v2751_v31 }
 0xc38   :  { %v2708_v33 = vsel %vm2676_vm10, %v2660_v24, %v2692_v30 }
 0xc39   :  { %v6182_v34 = vsel %vm59_vm9, %v2708_v33, -1e+09 }
 0xc3a   :  { %v2748_v35 = vsel %vm71_vm0, %v6182_v34, -inf }
 0xc3b   :  { %v2574_v36 = vpop.permute.xlu1 %2573  ;;  %2749 = vmax.xlane.f32.xlu0 %v2748_v35  ;;  %2743 = vmax.xlane.f32.xlu1 %v2742_v25 }
 0xc3c   :  { %v2663_v37 = vadd.f32 %v2637_v32, %v2574_v36 }
 0xc3e   :  { %v2695_v39 = vmul.f32 0.2, %v2663_v37  ;;  %vm2679_vm11 = vcmp.gt.f32.partialorder %v2663_v37, 0.0 }
 0xc3f   :  { %v2584_v40 = vpop.permute.xlu1 %2583 }
 0xc40   :  { %v2665_v41 = vadd.f32 %v2641_v38, %v2584_v40  ;;  %v2711_v42 = vsel %vm2679_vm11, %v2663_v37, %v2695_v39  ;;  %v2653_v40 = vrot.slane %v6146_v62, %v6143_v60 }
 0xc41   :  { %v6191_v44 = vsel %vm60_vm5, %v2711_v42, -1e+09 }
 0xc42   :  { %v2697_v45 = vmul.f32 0.2, %v2665_v41  ;;  %v2757_v46 = vsel %vm71_vm0, %v6191_v44, -inf  ;;  %vm2681_vm12 = vcmp.gt.f32.partialorder %v2665_v41, 0.0 }
 0xc43   :  { %v2569_v47 = vpop.permute.xlu1 %2568  ;;  %2758 = vmax.xlane.f32.xlu1 %v2757_v46  ;;  %v2657_v46 = vrot.slane %v6148_v1, %v6143_v60 }
 0xc44   :  { %v2662_v48 = vadd.f32 %v2637_v32, %v2569_v47  ;;  %v2713_v49 = vsel %vm2681_vm12, %v2665_v41, %v2697_v45 }
 0xc45   :  { %v6197_v50 = vsel %vm60_vm5, %v2713_v49, -1e+09 }
 0xc46   :  { %v2694_v51 = vmul.f32 0.2, %v2662_v48  ;;  %v2763_v52 = vsel %vm71_vm0, %v6197_v50, -inf  ;;  %vm2678_vm13 = vcmp.gt.f32.partialorder %v2662_v48, 0.0 }
 0xc47   :  { %v2579_v55 = vpop.permute.xlu1 %2578  ;;  %2764 = vmax.xlane.f32.xlu1 %v2763_v52 }
 0xc48   :  { %v2664_v56 = vadd.f32 %v2641_v38, %v2579_v55  ;;  %v2710_v58 = vsel %vm2678_vm13, %v2662_v48, %v2694_v51 }
 0xc49   :  { %v6205_v61 = vsel %vm59_vm9, %v2710_v58, -1e+09 }
 0xc4a   :  { %v2696_v0 = vmul.f32 0.2, %v2664_v56  ;;  %v2754_v3 = vsel %vm71_vm0, %v6205_v61, -inf  ;;  %vm2680_vm14 = vcmp.gt.f32.partialorder %v2664_v56, 0.0 }
 0xc4b   :  { %v2594_v4 = vpop.permute.xlu0 %2593  ;;  %2755 = vmax.xlane.f32.xlu0 %v2754_v3 }
 0xc4c   :  { %v2667_v5 = vadd.f32 %v2645_v57, %v2594_v4  ;;  %v2589_v6 = vpop.permute.xlu1 %2588  ;;  %v2712_v10 = vsel %vm2680_vm14, %v2664_v56, %v2696_v0 }
 0xc4d   :  { %v2666_v11 = vadd.f32 %v2645_v57, %v2589_v6  ;;  %v6213_v53 = vsel %vm59_vm9, %v2712_v10, -1e+09 }
 0xc4e   :  { %v2699_v12 = vmul.f32 0.2, %v2667_v5  ;;  %v2760_v13 = vsel %vm71_vm0, %v6213_v53, -inf  ;;  %vm2683_vm15 = vcmp.gt.f32.partialorder %v2667_v5, 0.0 }
 0xc4f   :  { %v2698_v14 = vmul.f32 0.2, %v2666_v11  ;;  %v2604_v18 = vpop.permute.xlu0 %2603  ;;  %2761 = vmax.xlane.f32.xlu0 %v2760_v13  ;;  %vm2682_vm2 = vcmp.gt.f32.partialorder %v2666_v11, 0.0 }
 0xc50   :  { %v2669_v19 = vadd.f32 %v2649_v9, %v2604_v18  ;;  %v2599_v21 = vpop.permute.xlu1 %2598  ;;  %v2715_v22 = vsel %vm2683_vm15, %v2667_v5, %v2699_v12 }
 0xc51   :  { %v2668_v24 = vadd.f32 %v2649_v9, %v2599_v21  ;;  %v6219_v54 = vsel %vm60_vm5, %v2715_v22, -1e+09  ;;  %v2714_v28 = vsel %vm2682_vm2, %v2666_v11, %v2698_v14 }
 0xc52   :  { %v2701_v29 = vmul.f32 0.2, %v2669_v19  ;;  %v2769_v30 = vsel %vm71_vm0, %v6219_v54, -inf  ;;  %v6225_v31 = vsel %vm59_vm9, %v2714_v28, -1e+09  ;;  %vm2685_vm4 = vcmp.gt.f32.partialorder %v2669_v19, 0.0 }
 0xc53   :  { %v2700_v32 = vmul.f32 0.2, %v2668_v24  ;;  %2770 = vmax.xlane.f32.xlu1 %v2769_v30  ;;  %v2766_v33 = vsel %vm71_vm0, %v6225_v31, -inf  ;;  %vm2684_vm6 = vcmp.gt.f32.partialorder %v2668_v24, 0.0 }
 0xc54   :  { %2767 = vmax.xlane.f32.xlu0 %v2766_v33  ;;  %v2717_v35 = vsel %vm2685_vm4, %v2669_v19, %v2701_v29 }
 0xc55   :  { %v6231_v25 = vsel %vm60_vm5, %v2717_v35, -1e+09  ;;  %v2716_v36 = vsel %vm2684_vm6, %v2668_v24, %v2700_v32 }
 0xc56   :  { %v2775_v37 = vsel %vm71_vm0, %v6231_v25, -inf  ;;  %v6237_v38 = vsel %vm59_vm9, %v2716_v36, -1e+09 }
 0xc57   :  { %2776 = vmax.xlane.f32.xlu1 %v2775_v37  ;;  %v2772_v39 = vsel %vm71_vm0, %v6237_v38, -inf }
 0xc58   :  { %2773 = vmax.xlane.f32.xlu0 %v2772_v39 }
 0xc5b   :  { %v2614_v41 = vpop.permute.xlu0 %2613 }
 0xc5c   :  { %v2671_v42 = vadd.f32 %v2653_v40, %v2614_v41  ;;  %v2609_v45 = vpop.permute.xlu1 %2608 }
 0xc5d   :  { %v2670_v47 = vadd.f32 %v2653_v40, %v2609_v45 }
 0xc5e   :  { %v2703_v48 = vmul.f32 0.2, %v2671_v42  ;;  %vm2687_vm7 = vcmp.gt.f32.partialorder %v2671_v42, 0.0 }
 0xc5f   :  { %v2702_v49 = vmul.f32 0.2, %v2670_v47  ;;  %v2624_v51 = vpop.permute.xlu0 %2623  ;;  %vm2686_vm8 = vcmp.gt.f32.partialorder %v2670_v47, 0.0 }
 0xc60   :  { %v2673_v52 = vadd.f32 %v2657_v46, %v2624_v51  ;;  %v2619_v55 = vpop.permute.xlu1 %2618  ;;  %v2719_v56 = vsel %vm2687_vm7, %v2671_v42, %v2703_v48 }
 0xc61   :  { %v2672_v57 = vadd.f32 %v2657_v46, %v2619_v55  ;;  %v6247_v58 = vsel %vm60_vm5, %v2719_v56, -1e+09  ;;  %v2718_v62 = vsel %vm2686_vm8, %v2670_v47, %v2702_v49 }
 0xc62   :  { %v2705_v0 = vmul.f32 0.2, %v2673_v52  ;;  %v2781_v3 = vsel %vm71_vm0, %v6247_v58, -inf  ;;  %v6253_v60 = vsel %vm59_vm9, %v2718_v62, -1e+09  ;;  %vm2689_vm10 = vcmp.gt.f32.partialorder %v2673_v52, 0.0 }
 0xc63   :  { %v2704_v1 = vmul.f32 0.2, %v2672_v57  ;;  %2782 = vmax.xlane.f32.xlu1 %v2781_v3  ;;  %v2778_v4 = vsel %vm71_vm0, %v6253_v60, -inf  ;;  %vm2688_vm11 = vcmp.gt.f32.partialorder %v2672_v57, 0.0 }
 0xc64   :  { %2779 = vmax.xlane.f32.xlu0 %v2778_v4  ;;  %v2721_v5 = vsel %vm2689_vm10, %v2673_v52, %v2705_v0 }
 0xc65   :  { %v6259_v6 = vsel %vm60_vm5, %v2721_v5, -1e+09  ;;  %v2720_v9 = vsel %vm2688_vm11, %v2672_v57, %v2704_v1 }
 0xc66   :  { %v2787_v10 = vsel %vm71_vm0, %v6259_v6, -inf  ;;  %v6265_v11 = vsel %vm59_vm9, %v2720_v9, -1e+09  ;;  %vm3716_vm9 = vcmask 15360  }
 0xc67   :  { %2788 = vmax.xlane.f32.xlu1 %v2787_v10  ;;  %v2784_v12 = vsel %vm71_vm0, %v6265_v11, -inf }
 0xc68   :  { %2785 = vmax.xlane.f32.xlu0 %v2784_v12 }
 0xcc0   :  { %v2747_v13 = vpop.xlane.xlu0 %2746 }
 0xcc1   :  { %v2791_v14 = vsub.f32 %v6159_v2, %v2747_v13 }
 0xcc3   :  { %v2808_v18 = vmul.f32 1.442695, %v2791_v14 }
 0xcc4   :  { %v2753_v8 = vpop.xlane.xlu1 %2752 }
 0xcc5   :  { %5306 = vpow2.f32 %v2808_v18  ;;  %v2793_v19 = vsub.f32 %v6171_v27, %v2753_v8 }
 0xcc7   :  { %v2812_v21 = vmul.f32 1.442695, %v2793_v19 }
 0xcc8   :  { %v2750_v22 = vpop.xlane.xlu0 %2749  ;;  %v2744_v24 = vpop.xlane.xlu1 %2743 }
 0xcc9   :  { %5308 = vpow2.f32 %v2812_v21  ;;  %v2792_v23 = vsub.f32 %v6182_v34, %v2750_v22  ;;  %v2790_v28 = vsub.f32 %v6177_v7, %v2744_v24 }
 0xccb   :  { %v2806_v29 = vmul.f32 1.442695, %v2790_v28  ;;  %v2810_v30 = vmul.f32 1.442695, %v2792_v23 }
 0xccd   :  { %5310 = vpow2.f32 %v2806_v29 }
 0xcce   :  { %5312 = vpow2.f32 %v2810_v30 }
 0xccf   :  { %v6273_v32 = vpop.eup %5306 }
 0xcd0   :  { %v2759_v2 = vpop.xlane.xlu1 %2758  ;;  %v2841_v33 = vsel %vm71_vm0, %v6273_v32, 0.0 }
 0xcd1   :  { %v2795_v27 = vsub.f32 %v6191_v44, %v2759_v2  ;;  %2842 = vadd.xlane.f32.xlu1 %v2841_v33 }
 0xcd3   :  { %v6278_v35 = vpop.eup %5308  ;;  %v2816_v36 = vmul.f32 1.442695, %v2795_v27 }
 0xcd4   :  { %v2765_v37 = vpop.xlane.xlu1 %2764  ;;  %v2847_v7 = vsel %vm71_vm0, %v6278_v35, 0.0 }
 0xcd5   :  { %5314 = vpow2.f32 %v2816_v36  ;;  %v2797_v34 = vsub.f32 %v6197_v50, %v2765_v37  ;;  %2848 = vadd.xlane.f32.xlu1 %v2847_v7 }
 0xcd7   :  { %v2820_v39 = vmul.f32 1.442695, %v2797_v34  ;;  %v6283_v40 = vpop.eup %5310 }
 0xcd8   :  { %v2756_v41 = vpop.xlane.xlu0 %2755  ;;  %v2838_v44 = vsel %vm71_vm0, %v6283_v40, 0.0  ;;  %v6288_v45 = vpop.eup %5312 }
 0xcd9   :  { %5316 = vpow2.f32 %v2820_v39  ;;  %v2794_v42 = vsub.f32 %v6205_v61, %v2756_v41  ;;  %2839 = vadd.xlane.f32.xlu0 %v2838_v44  ;;  %v2844_v50 = vsel %vm71_vm0, %v6288_v45, 0.0 }
 0xcdb   :  { %v2814_v46 = vmul.f32 1.442695, %v2794_v42 }
 0xcdc   :  { %v2762_v47 = vpop.xlane.xlu0 %2761 }
 0xcdd   :  { %5318 = vpow2.f32 %v2814_v46  ;;  %v2796_v48 = vsub.f32 %v6213_v53, %v2762_v47  ;;  %2845 = vadd.xlane.f32.xlu0 %v2844_v50 }
 0xcdf   :  { %v6293_v49 = vpop.eup %5314  ;;  %v2818_v51 = vmul.f32 1.442695, %v2796_v48 }
 0xce0   :  { %v2771_v52 = vpop.xlane.xlu1 %2770  ;;  %v2853_v61 = vsel %vm71_vm0, %v6293_v49, 0.0 }
 0xce1   :  { %5320 = vpow2.f32 %v2818_v51  ;;  %v2799_v55 = vsub.f32 %v6219_v54, %v2771_v52  ;;  %v2768_v56 = vpop.xlane.xlu0 %2767  ;;  %2854 = vadd.xlane.f32.xlu1 %v2853_v61 }
 0xce2   :  { %v2798_v57 = vsub.f32 %v6225_v31, %v2768_v56 }
 0xce3   :  { %v6299_v62 = vpop.eup %5316  ;;  %v2824_v53 = vmul.f32 1.442695, %v2799_v55 }
 0xce4   :  { %v2822_v0 = vmul.f32 1.442695, %v2798_v57  ;;  %v2777_v3 = vpop.xlane.xlu1 %2776  ;;  %v2859_v1 = vsel %vm71_vm0, %v6299_v62, 0.0 }
 0xce5   :  { %5322 = vpow2.f32 %v2824_v53  ;;  %v2801_v4 = vsub.f32 %v6231_v25, %v2777_v3  ;;  %v2774_v5 = vpop.xlane.xlu0 %2773  ;;  %2860 = vadd.xlane.f32.xlu1 %v2859_v1 }
 0xce6   :  { %5324 = vpow2.f32 %v2822_v0  ;;  %v2800_v54 = vsub.f32 %v6237_v38, %v2774_v5 }
 0xce7   :  { %v6305_v9 = vpop.eup %5318  ;;  %v2828_v10 = vmul.f32 1.442695, %v2801_v4 }
 0xce8   :  { %v2826_v31 = vmul.f32 1.442695, %v2800_v54  ;;  %v2850_v12 = vsel %vm71_vm0, %v6305_v9, 0.0 }
 0xce9   :  { %5326 = vpow2.f32 %v2828_v10  ;;  %2851 = vadd.xlane.f32.xlu0 %v2850_v12 }
 0xcea   :  { %5328 = vpow2.f32 %v2826_v31 }
 0xceb   :  { %v6309_v13 = vpop.eup %5320 }
 0xcec   :  { %v2856_v25 = vsel %vm71_vm0, %v6309_v13, 0.0 }
 0xced   :  { %2857 = vadd.xlane.f32.xlu0 %v2856_v25 }
 0xcef   :  { %v6313_v14 = vpop.eup %5322 }
 0xcf0   :  { %v6315_v18 = vpop.eup %5324  ;;  %v2783_v38 = vpop.xlane.xlu1 %2782  ;;  %v2865_v8 = vsel %vm71_vm0, %v6313_v14, 0.0 }
 0xcf1   :  { %v2803_v19 = vsub.f32 %v6247_v58, %v2783_v38  ;;  %v2780_v21 = vpop.xlane.xlu0 %2779  ;;  %2866 = vadd.xlane.f32.xlu1 %v2865_v8  ;;  %v2862_v22 = vsel %vm71_vm0, %v6315_v18, 0.0 }
 0xcf2   :  { %v2802_v24 = vsub.f32 %v6253_v60, %v2780_v21  ;;  %2863 = vadd.xlane.f32.xlu0 %v2862_v22 }
 0xcf3   :  { %v6323_v23 = vpop.eup %5326  ;;  %v2832_v28 = vmul.f32 1.442695, %v2803_v19 }
 0xcf4   :  { %v6325_v29 = vpop.eup %5328  ;;  %v2830_v30 = vmul.f32 1.442695, %v2802_v24  ;;  %v2789_v2 = vpop.xlane.xlu1 %2788  ;;  %v2871_v33 = vsel %vm71_vm0, %v6323_v23, 0.0 }
 0xcf5   :  { %5330 = vpow2.f32 %v2832_v28  ;;  %v2805_v58 = vsub.f32 %v6259_v6, %v2789_v2  ;;  %v2786_v27 = vpop.xlane.xlu0 %2785  ;;  %2872 = vadd.xlane.f32.xlu1 %v2871_v33  ;;  %v2868_v36 = vsel %vm71_vm0, %v6325_v29, 0.0 }
 0xcf6   :  { %5332 = vpow2.f32 %v2830_v30  ;;  %v2804_v60 = vsub.f32 %v6265_v11, %v2786_v27  ;;  %2869 = vadd.xlane.f32.xlu0 %v2868_v36  ;;  %v3613_v27 = vld [vmem:[%s6550_s13 + $0x8] sm:$0xff] }
 0xcf7   :  { %v2836_v37 = vmul.f32 1.442695, %v2805_v58  ;;  %v3612_v58 = vld [vmem:[%s6550_s13] sm:$0xff] }
 0xcf8   :  { %v2834_v7 = vmul.f32 1.442695, %v2804_v60  ;;  %v5258_v36 = vpack.c.bf16 %v3613_v27, %v3612_v58  ;;  %v3614_v60 = vld [vmem:[%s6550_s13 + $0x10] sm:$0xff] }
 0xcf9   :  { %5334 = vpow2.f32 %v2836_v37  ;;  %v3615_v37 = vld [vmem:[%s6550_s13 + $0x18] sm:$0xff] }
 0xcfa   :  { %5336 = vpow2.f32 %v2834_v7  ;;  %v5262_v7 = vpack.c.bf16 %v3615_v37, %v3614_v60  ;;  %v64_v37 = vld [vmem:[%s6539_s2 + $0x8] sm:$0xff] }
 0xcfb   :  { %vm3703_vm5 = vcmp.gt.f32.partialorder %v64_v37, 0.0 }
 0xcff   :  { %v6333_v34 = vpop.eup %5330 }
 0xd00   :  { %v6335_v39 = vpop.eup %5332  ;;  %v2877_v6 = vsel %vm71_vm0, %v6333_v34, 0.0 }
 0xd01   :  { %2878 = vadd.xlane.f32.xlu1 %v2877_v6  ;;  %v2874_v41 = vsel %vm71_vm0, %v6335_v39, 0.0 }
 0xd02   :  { %2875 = vadd.xlane.f32.xlu0 %v2874_v41 }
 0xd03   :  { %v6341_v42 = vpop.eup %5334 }
 0xd04   :  { %v6343_v11 = vpop.eup %5336  ;;  %v2883_v44 = vsel %vm71_vm0, %v6341_v42, 0.0 }
 0xd05   :  { %2884 = vadd.xlane.f32.xlu1 %v2883_v44  ;;  %v2880_v46 = vsel %vm71_vm0, %v6343_v11, 0.0 }
 0xd06   :  { %2881 = vadd.xlane.f32.xlu0 %v2880_v46 }
 0xd5e   :  { %v2843_v47 = vpop.xlane.xlu1 %2842 }
 0xd5f   :  { %5338 = vrcp.f32 %v2843_v47 }
 0xd62   :  { %v2849_v50 = vpop.xlane.xlu1 %2848 }
 0xd66   :  { %v2840_v48 = vpop.xlane.xlu0 %2839 }
 0xd67   :  { %5340 = vrcp.f32 %v2840_v48 }
 0xd68   :  { %5342 = vrcp.f32 %v2849_v50 }
 0xd69   :  { %v5339_v52 = vpop.eup %5338 }
 0xd6a   :  { %v2846_v51 = vpop.xlane.xlu0 %2845  ;;  %v2889_v57 = vmul.f32 %v5339_v52, %v6273_v32 }
 0xd6b   :  { %5344 = vrcp.f32 %v2846_v51 }
 0xd6e   :  { %v2855_v61 = vpop.xlane.xlu1 %2854 }
 0xd6f   :  { %5346 = vrcp.f32 %v2855_v61 }
 0xd71   :  { %v5341_v55 = vpop.eup %5340 }
 0xd72   :  { %v2887_v56 = vmul.f32 %v5341_v55, %v6283_v40  ;;  %v5343_v53 = vpop.eup %5342  ;;  %v2861_v1 = vpop.xlane.xlu1 %2860 }
 0xd73   :  { %v2893_v5 = vmul.f32 %v5343_v53, %v6278_v35 }
 0xd74   :  { %4802 = vmatprep.mubr.msk.f32.mxu0 %vm71_vm0, %v2887_v56 }
 0xd75   :  { %v5345_v0 = vpop.eup %5344  ;;  %4803 = vmatmul.mubr.msk.f32.vlgmr.msra.gmra.mrb[30].mxu0 %vm71_vm0, %v2889_v57 }
 0xd76   :  { %v2852_v3 = vpop.xlane.xlu0 %2851  ;;  %5233 = vmatpush3.bf16.msra.mxu0 %v6005_v26  ;;  %v2891_v4 = vmul.f32 %v5345_v0, %v6288_v45 }
 0xd77   :  { %5348 = vrcp.f32 %v2852_v3  ;;  %5239 = vmatprep.subr.bf16.mxu0 %v6039_v43 }
 0xd78   :  { %4809 = vmatprep.mubr.msk.f32.mxu0 %vm71_vm0, %v2891_v4  ;;  %5350 = vrcp.f32 %v2861_v1 }
 0xd79   :  { %4810 = vmatmul.mubr.msk.f32.vlgmr.msra.gmra.mrb[32].mxu0 %vm71_vm0, %v2893_v5  ;;  %v5347_v54 = vpop.eup %5346 }
 0xd7a   :  { %v2858_v32 = vpop.xlane.xlu0 %2857  ;;  %5241 = vmatpush3.bf16.msra.mxu0 %v6039_v43  ;;  %v2897_v31 = vmul.f32 %v5347_v54, %v6293_v49 }
 0xd7b   :  { %5352 = vrcp.f32 %v2858_v32  ;;  %5247 = vmatprep.subr.bf16.mxu0 %v6079_v63 }
 0xd7e   :  { %v2867_v40 = vpop.xlane.xlu1 %2866 }
 0xd7f   :  { %5354 = vrcp.f32 %v2867_v40  ;;  %v2864_v26 = vpop.xlane.xlu0 %2863 }
 0xd80   :  { %5356 = vrcp.f32 %v2864_v26 }
 0xd81   :  { %v5349_v45 = vpop.eup %5348 }
 0xd82   :  { %v2873_v35 = vpop.xlane.xlu1 %2872  ;;  %v2895_v10 = vmul.f32 %v5349_v45, %v6305_v9  ;;  %v5351_v25 = vpop.eup %5350 }
 0xd83   :  { %5358 = vrcp.f32 %v2873_v35  ;;  %v2870_v12 = vpop.xlane.xlu0 %2869  ;;  %v2901_v8 = vmul.f32 %v5351_v25, %v6299_v62 }
 0xd84   :  { %5360 = vrcp.f32 %v2870_v12  ;;  %4816 = vmatprep.mubr.msk.f32.mxu1 %vm71_vm0, %v2895_v10 }
 0xd85   :  { %v5353_v43 = vpop.eup %5352  ;;  %4817 = vmatmul.mubr.msk.f32.vlgmr.msra.gmra.mrb[26].mxu1 %vm71_vm0, %v2897_v31 }
 0xd86   :  { %5245 = vmatpush3.bf16.msra.mxu1 %v6077_v59  ;;  %v2899_v38 = vmul.f32 %v5353_v43, %v6309_v13 }
 0xd87   :  { %5251 = vmatprep.subr.bf16.mxu1 %v6111_v17 }
 0xd88   :  { %4823 = vmatprep.mubr.msk.f32.mxu0 %vm71_vm0, %v2899_v38 }
 0xd89   :  { %v5355_v49 = vpop.eup %5354  ;;  %4824 = vmatmul.mubr.msk.f32.vlgmr.msra.gmra.mrb[34].mxu0 %vm71_vm0, %v2901_v8 }
 0xd8a   :  { %v5357_v9 = vpop.eup %5356  ;;  %5249 = vmatpush3.bf16.msra.mxu0 %v6079_v63  ;;  %v2905_v59 = vmul.f32 %v5355_v49, %v6313_v14 }
 0xd8b   :  { %5255 = vmatprep.subr.bf16.mxu0 %v6113_v20  ;;  %v2903_v19 = vmul.f32 %v5357_v9, %v6315_v18 }
 0xd8d   :  { %v5359_v21 = vpop.eup %5358  ;;  %4830 = vmatprep.mubr.msk.f32.mxu1 %vm71_vm0, %v2903_v19 }
 0xd8e   :  { %v5361_v62 = vpop.eup %5360  ;;  %4831 = vmatmul.mubr.msk.f32.vlgmr.msra.gmra.mrb[28].mxu1 %vm71_vm0, %v2905_v59  ;;  %v2879_v13 = vpop.xlane.xlu1 %2878  ;;  %v2909_v63 = vmul.f32 %v5359_v21, %v6323_v23 }
 0xd8f   :  { %5253 = vmatpush3.bf16.msra.mxu1 %v6111_v17  ;;  %5362 = vrcp.f32 %v2879_v13  ;;  %v2876_v22 = vpop.xlane.xlu0 %2875  ;;  %v2907_v24 = vmul.f32 %v5361_v62, %v6325_v29  ;;  %v4132_v13 = vld [vmem:[%s6553_s16 + $0x8] ss:$0 sm:$0xff] }
 0xd90   :  { %5364 = vrcp.f32 %v2876_v22  ;;  %5259 = vmatprep.subr.bf16.mxu1 %v5258_v36 }
 0xd91   :  { %4837 = vmatprep.mubr.msk.f32.mxu0 %vm71_vm0, %v2907_v24 }
 0xd92   :  { %4838 = vmatmul.mubr.msk.f32.vlgmr.msra.gmra.mrb[36].mxu0 %vm71_vm0, %v2909_v63  ;;  %v2885_v14 = vpop.xlane.xlu1 %2884 }
 0xd93   :  { %5257 = vmatpush3.bf16.msra.mxu0 %v6113_v20  ;;  %5366 = vrcp.f32 %v2885_v14  ;;  %v2882_v18 = vpop.xlane.xlu0 %2881  ;;  %v4133_v14 = vld [vmem:[%s6553_s16 + $0x9] ss:$0 sm:$0xff] }
 0xd94   :  { %5368 = vrcp.f32 %v2882_v18  ;;  %5266 = vmatprep.subr.bf16.mxu0 %v5402_v15 }
 0xd99   :  { %v5363_v17 = vpop.eup %5362 }
 0xd9a   :  { %v5365_v28 = vpop.eup %5364  ;;  %v2913_v29 = vmul.f32 %v5363_v17, %v6333_v34 }
 0xd9b   :  { %v2911_v30 = vmul.f32 %v5365_v28, %v6335_v39 }
 0xd9d   :  { %v5367_v23 = vpop.eup %5366  ;;  %4844 = vmatprep.mubr.msk.f32.mxu1 %vm71_vm0, %v2911_v30 }
 0xd9e   :  { %v5369_v2 = vpop.eup %5368  ;;  %4845 = vmatmul.mubr.msk.f32.vlgmr.msra.gmra.mrb[30].mxu1 %vm71_vm0, %v2913_v29  ;;  %v2917_v20 = vmul.f32 %v5367_v23, %v6341_v42 }
 0xd9f   :  { %v2915_v33 = vmul.f32 %v5369_v2, %v6343_v11  ;;  %5261 = vmatpush3.bf16.msra.mxu1 %v5258_v36 }
 0xda0   :  { %5263 = vmatprep.subr.bf16.mxu1 %v5262_v7 }
 0xda1   :  { %4851 = vmatprep.mubr.msk.f32.mxu0 %vm71_vm0, %v2915_v33 }
 0xda2   :  { %4852 = vmatmul.mubr.msk.f32.vlgmr.msra.gmra.mrb[38].mxu0 %vm71_vm0, %v2917_v20  ;;  %v4134_v20 = vld [vmem:[%s6553_s16 + $0xa] ss:$0 sm:$0xff] }
 0xda3   :  { %4869 = vmatprep.mubr.msk.f32.mxu0 %vm5403_vm3, %v5404_v16  ;;  %5265 = vmatpush3.bf16.msra.mxu1 %v5262_v7  ;;  %v63_v7 = vld [vmem:[%s6539_s2] sm:$0xff] }
 0xda4   :  { %5275 = vmatprep.subr.bf16.mxu1 %v5402_v15  ;;  %vm3702_vm12 = vcmp.gt.f32.partialorder %v63_v7, 0.0 }
 0xe48   :  { %v4804_v34 = vpop.f32.mrb[30].mxu0 }
 0xe49   :  { %v2990_v39 = vpop.f32.mrb[31].mxu0  ;;  %v3581_v41 = vsel %vm246_vm1, %v4804_v34, 0.0 }
 0xe4a   :  { %v3566_v44 = vsel %vm246_vm1, %v2990_v39, 0.0 }
 0xe4c   :  { %v4811_v6 = vpop.f32.mrb[32].mxu0 }
 0xe4d   :  { %v3582_v42 = vsel %vm246_vm1, %v4811_v6, 0.0  ;;  %v3071_v11 = vpop.f32.mrb[33].mxu0 }
 0xe4e   :  { %v3583_v46 = vadd.f32 %v3582_v42, %v3581_v41  ;;  %v3567_v47 = vsel %vm246_vm1, %v3071_v11, 0.0 }
 0xe4f   :  { %v3568_v48 = vadd.f32 %v3567_v47, %v3566_v44 }
 0xe58   :  { %v4818_v50 = vpop.f32.mrb[26].mxu1 }
 0xe59   :  { %v3584_v51 = vsel %vm246_vm1, %v4818_v50, 0.0  ;;  %v3152_v52 = vpop.f32.mrb[27].mxu1 }
 0xe5a   :  { %v3585_v61 = vadd.f32 %v3584_v51, %v3583_v46  ;;  %v3569_v55 = vsel %vm246_vm1, %v3152_v52, 0.0 }
 0xe5b   :  { %v3570_v56 = vadd.f32 %v3569_v55, %v3568_v48 }
 0xe5c   :  { %v4825_v57 = vpop.f32.mrb[34].mxu0 }
 0xe5d   :  { %v3586_v53 = vsel %vm246_vm1, %v4825_v57, 0.0  ;;  %v3233_v0 = vpop.f32.mrb[35].mxu0 }
 0xe5e   :  { %v3587_v3 = vadd.f32 %v3586_v53, %v3585_v61  ;;  %v3571_v1 = vsel %vm246_vm1, %v3233_v0, 0.0 }
 0xe5f   :  { %v3572_v4 = vadd.f32 %v3571_v1, %v3570_v56 }
 0xe61   :  { %v4832_v5 = vpop.f32.mrb[28].mxu1 }
 0xe62   :  { %v3588_v32 = vsel %vm246_vm1, %v4832_v5, 0.0  ;;  %v3314_v40 = vpop.f32.mrb[29].mxu1 }
 0xe63   :  { %v3589_v26 = vadd.f32 %v3588_v32, %v3587_v3  ;;  %v3573_v54 = vsel %vm246_vm1, %v3314_v40, 0.0 }
 0xe64   :  { %v3574_v45 = vadd.f32 %v3573_v54, %v3572_v4 }
 0xe65   :  { %v4839_v35 = vpop.f32.mrb[36].mxu0 }
 0xe66   :  { %v3590_v10 = vsel %vm246_vm1, %v4839_v35, 0.0  ;;  %v3395_v31 = vpop.f32.mrb[37].mxu0 }
 0xe67   :  { %v3591_v12 = vadd.f32 %v3590_v10, %v3589_v26  ;;  %v3575_v25 = vsel %vm246_vm1, %v3395_v31, 0.0 }
 0xe68   :  { %v3576_v43 = vadd.f32 %v3575_v25, %v3574_v45 }
 0xe71   :  { %v4846_v38 = vpop.f32.mrb[30].mxu1 }
 0xe72   :  { %v3592_v8 = vsel %vm246_vm1, %v4846_v38, 0.0  ;;  %v3476_v49 = vpop.f32.mrb[31].mxu1  ;;  %v3852_v38 = vld [vmem:[%s6551_s14 + $0x8] sm:$0xff] }
 0xe73   :  { %v3593_v9 = vadd.f32 %v3592_v8, %v3591_v12  ;;  %v3577_v19 = vsel %vm246_vm1, %v3476_v49, 0.0  ;;  %v3853_v49 = vld [vmem:[%s6551_s14 + $0x10] sm:$0xff] }
 0xe74   :  { %v3578_v59 = vadd.f32 %v3577_v19, %v3576_v43  ;;  %v3851_v43 = vld [vmem:[%s6551_s14] sm:$0xff] }
 0xe75   :  { %v4853_v21 = vpop.f32.mrb[38].mxu0  ;;  %v5270_v8 = vpack.c.bf16 %v3852_v38, %v3851_v43 }
 0xe76   :  { %v3594_v62 = vsel %vm246_vm1, %v4853_v21, 0.0  ;;  %v3557_v22 = vpop.f32.mrb[39].mxu0  ;;  %v3934_v21 = vld [vmem:[%s6552_s15] sm:$0xff] }
 0xe77   :  { %v3595_v24 = vadd.f32 %v3594_v62, %v3593_v9  ;;  %v3579_v63 = vsel %vm246_vm1, %v3557_v22, 0.0  ;;  %v3854_v9 = vld [vmem:[%s6551_s14 + $0x18] sm:$0xff]  ;;  %v3935_v62 = vld [vmem:[%s6552_s15 + $0x8] sm:$0xff] }
 0xe78   :  { %v3580_v18 = vadd.f32 %v3579_v63, %v3578_v59  ;;  %v5273_v59 = vpack.c.bf16 %v3854_v9, %v3853_v49  ;;  %v5276_v22 = vpack.c.bf16 %v3935_v62, %v3934_v21  ;;  %v3938_v63 = vld [vmem:[%s6552_s15 + $0x20] sm:$0xff] }
 0xe79   :  { %v3602_v17 = vmul.f32 %v4132_v13, %v3595_v24 }
 0xe7a   :  { %v3601_v28 = vmul.f32 %v4132_v13, %v3580_v18  ;;  %v3936_v13 = vld [vmem:[%s6552_s15 + $0x10] sm:$0xff] }
 0xe7b   :  { %v3609_v30 = vadd.f32 %v4133_v14, %v3602_v17  ;;  %v3940_v17 = vld [vmem:[%s6552_s15 + $0x30] sm:$0xff] }
 0xe7c   :  { %v3608_v29 = vadd.f32 %v4133_v14, %v3601_v28  ;;  %v3939_v14 = vld [vmem:[%s6552_s15 + $0x28] sm:$0xff]  ;;  %v3941_v28 = vld [vmem:[%s6552_s15 + $0x38] sm:$0xff] }
 0xe7d   :  { %v3611_v23 = vmax.f32 %v3609_v30, 0.0  ;;  %v5282_v18 = vpack.c.bf16 %v3939_v14, %v3938_v63  ;;  %v5285_v30 = vpack.c.bf16 %v3941_v28, %v3940_v17 }
 0xe7e   :  { %v3610_v2 = vmax.f32 %v3608_v29, 0.0  ;;  %v3942_v29 = vld [vmem:[%s6552_s15 + $0x40] sm:$0xff] }
 0xe80   :  { %4862 = vmatprep.mubr.msk.f32.mxu1 %vm246_vm1, %v3610_v2  ;;  %v5267_v33 = vpack.c.bf16 %v3611_v23, %v3610_v2 }
 0xe81   :  { %4863 = vmatmul.mubr.msk.f32.vlgmr.msra.gmra.mrb[32].mxu1 %vm246_vm1, %v3611_v23  ;;  %v3943_v23 = vld [vmem:[%s6552_s15 + $0x48] sm:$0xff] }
 0xe82   :  { %5268 = vmatpush3.bf16.msra.mxu0 %v5267_v33  ;;  %4915 = vmatprep.mubr.msk.f32.mxu1 %vm5403_vm3, %v5404_v16  ;;  %v5288_v2 = vpack.c.bf16 %v3943_v23, %v3942_v29  ;;  %v3944_v33 = vld [vmem:[%s6552_s15 + $0x50] sm:$0xff] }
 0xe83   :  { %5269 = vmatprep.subr.bf16.mxu0 %v5402_v15  ;;  %5277 = vmatpush3.bf16.msra.mxu1 %v5276_v22 }
 0xe84   :  { %5278 = vmatprep.subr.bf16.mxu1 %v5402_v15 }
 0xf54   :  { %v4864_v58 = vpop.f32.mrb[32].mxu1 }
 0xf55   :  { %v3699_v27 = vadd.f32 %v4864_v58, %v4134_v20  ;;  %v3693_v36 = vpop.f32.mrb[33].mxu1 }
 0xf56   :  { %v3694_v60 = vadd.f32 %v4134_v20, %v3693_v36  ;;  %v3945_v20 = vld [vmem:[%s6552_s15 + $0x58] sm:$0xff]  ;;  %v3947_v36 = vld [vmem:[%s6552_s15 + $0x68] sm:$0xff] }
 0xf57   :  { %3711 = vperm.xlu1 %5305, %v3699_v27   ;;  %v5291_v58 = vpack.c.bf16 %v3945_v20, %v3944_v33  ;;  %v3946_v27 = vld [vmem:[%s6552_s15 + $0x60] sm:$0xff] }
 0xf58   :  { %3706 = vperm.xlu0 %5304, %v3694_v60   ;;  %v5294_v60 = vpack.c.bf16 %v3947_v36, %v3946_v27 }
 0xfd6   :  { %v3712_v34 = vpop.permute.xlu1 %3711 }
 0xfd7   :  { %v3715_v39 = vsel %vm3703_vm5, %v3712_v34, -1e+09  ;;  %v3707_v6 = vpop.permute.xlu0 %3706  ;;  %v3948_v34 = vld [vmem:[%s6552_s15 + $0x70] sm:$0xff] }
 0xfd8   :  { %v3718_v41 = vsel %vm3716_vm9, %v3715_v39, -inf  ;;  %v3714_v42 = vsel %vm3702_vm12, %v3707_v6, -1e+09 }
 0xfd9   :  { %v3717_v11 = vsel %vm3716_vm9, %v3714_v42, -inf }
 0xfda   :  { %v3719_v44 = vmax.f32 %v3717_v11, %v3718_v41  ;;  %v4138_v41 = vld [vmem:[%s6553_s16 + $0xb] ss:$0 sm:$0xff] }
 0xfdc   :  { %v3720_v46 = vrot.slane %v3719_v44, 4 }
 0xfde   :  { %v3721_v47 = vmax.f32 %v3719_v44, %v3720_v46  ;;  %v4140_v46 = vld [vmem:[%s6553_s16 + $0xc] ss:$0 sm:$0xff] }
 0xfe0   :  { %v3722_v48 = vrot.slane %v3721_v47, 2 }
 0xfe2   :  { %v3723_v50 = vmax.f32 %v3721_v47, %v3722_v48 }
 0xfe4   :  { %v3724_v51 = vrot.slane %v3723_v50, 1 }
 0xfe6   :  { %v3725_v52 = vmax.f32 %v3723_v50, %v3724_v51 }
 0xfe8   :  { %v3726_v61 = vsub.f32 %v3714_v42, %v3725_v52  ;;  %v3727_v55 = vsub.f32 %v3715_v39, %v3725_v52  ;;  %v3949_v39 = vld [vmem:[%s6552_s15 + $0x78] sm:$0xff] }
 0xfe9   :  { %v5297_v6 = vpack.c.bf16 %v3949_v39, %v3948_v34 }
 0xfea   :  { %v3728_v56 = vmul.f32 1.442695, %v3726_v61  ;;  %v3730_v57 = vmul.f32 1.442695, %v3727_v55 }
 0xfec   :  { %5370 = vpow2.f32 %v3728_v56 }
 0xfed   :  { %5372 = vpow2.f32 %v3730_v57 }
 0xff6   :  { %v5371_v53 = vpop.eup %5370 }
 0xff7   :  { %v5373_v0 = vpop.eup %5372  ;;  %v3732_v3 = vsel %vm3716_vm9, %v5371_v53, 0.0 }
 0xff8   :  { %v3733_v1 = vsel %vm3716_vm9, %v5373_v0, 0.0 }
 0xff9   :  { %v3734_v4 = vadd.f32 %v3733_v1, %v3732_v3 }
 0xffb   :  { %v3735_v5 = vrot.slane %v3734_v4, 4 }
 0xffd   :  { %v3736_v32 = vadd.f32 %v3735_v5, %v3734_v4 }
 0xfff   :  { %v3737_v40 = vrot.slane %v3736_v32, 2 }
0x1001   :  { %v3738_v26 = vadd.f32 %v3737_v40, %v3736_v32 }
0x1003   :  { %v3739_v54 = vrot.slane %v3738_v26, 1 }
0x1005   :  { %v3740_v45 = vadd.f32 %v3739_v54, %v3738_v26 }
0x1007   :  { %5374 = vrcp.f32 %v3740_v45 }
0x1011   :  { %v5375_v35 = vpop.eup %5374 }
0x1012   :  { %v3742_v10 = vmul.f32 %v5375_v35, %v5371_v53  ;;  %v3743_v12 = vmul.f32 %v5375_v35, %v5373_v0 }
0x1014   :  { %v3744_v31 = vmul.f32 %v3742_v10, %v63_v7  ;;  %v3745_v25 = vmul.f32 %v3743_v12, %v64_v37 }
0x1016   :  { %3746 = vxpose.xlu1.b32.start [1/2] (short) (narrow) %v3744_v31, 8 }
0x101a   :  { %3747 = vxpose.xlu1.b32.end [2/2] (short) (narrow) %v3745_v25, 8 }
0x1096   :  { %v3762_v19 = vpop.trf.xlu1 }
0x1097   :  { %4870 = vmatmul.mubr.msk.f32.vlgmr.msra.gmra.mrb[40].mxu0 %vm71_vm0, %v3762_v19 }
0x1098   :  { %5271 = vmatpush3.bf16.msra.mxu0 %v5270_v8  ;;  %4880 = vmatprep.mubr.msk.f32.mxu0 %vm5403_vm3, %v5404_v16  ;;  %v3937_v16 = vld [vmem:[%s6552_s15 + $0x18] sm:$0xff]  ;;  %s5378_s15 = scalar_lea.vmem %s4033_s26, 32 }
0x1099   :  { %5272 = vmatprep.subr.bf16.mxu0 %v5402_v15  ;;  %v5279_v24 = vpack.c.bf16 %v3937_v16, %v3936_v13  ;;  %p5379_p0 = scmp.ne.s32.totalorder %s4033_s26, %s5378_s15  ;;  %p5384_p2 = scmp.lt.s32.totalorder %s5378_s15, %s5378_s15 }
0x109b   :  { %5280 = vmatpush3.bf16.msra.mxu1 %v5279_v24  ;;  %p5385_p3 = por %p5384_p2, %p5383_p1 }
0x109c   :  { %5274 = vmatpush3.bf16.msra.mxu0 %v5273_v59  ;;  %5281 = vmatprep.subr.bf16.mxu1 %v5402_v15 }
0x109d   :  { %p5386_p4 = pnand %p5385_p3, %p5379_p0 }
0x109f   :  { %5283 = vmatpush3.bf16.msra.mxu1 %v5282_v18 }
0x10a0   :  { %5284 = vmatprep.subr.bf16.mxu1 %v5402_v15 }
0x10a3   :  { %5286 = vmatpush3.bf16.msra.mxu1 %v5285_v30 }
0x10a4   :  { %5287 = vmatprep.subr.bf16.mxu1 %v5402_v15 }
0x10a7   :  { %5289 = vmatpush3.bf16.msra.mxu1 %v5288_v2 }
0x10a8   :  { %5290 = vmatprep.subr.bf16.mxu1 %v5402_v15 }
0x10ab   :  { %5292 = vmatpush3.bf16.msra.mxu1 %v5291_v58 }
0x10ac   :  { %5293 = vmatprep.subr.bf16.mxu1 %v5402_v15 }
0x10af   :  { %5295 = vmatpush3.bf16.msra.mxu1 %v5294_v60 }
0x10b0   :  { %5296 = vmatprep.subr.bf16.mxu1 %v5402_v15 }
0x10b3   :  { %5298 = vmatpush3.bf16.msra.mxu1 %v5297_v6 }
0x116a   :  { %v3847_v37 = vpop.f32.mrb[40].mxu0 }
0x116b   :  { %v4871_v7 = vpop.f32.mrb[41].mxu0  ;;  %4881 = vmatmul.mubr.msk.f32.vlgmr.msra.gmra.mrb[42].mxu0 %vm246_vm1, %v3847_v37 }
0x123e   :  { %v3929_v42 = vpop.f32.mrb[42].mxu0 }
0x123f   :  { %v3930_v15 = vadd.f32 %v4138_v41, %v3929_v42  ;;  %v4882_v11 = vpop.f32.mrb[43].mxu0 }
0x1241   :  { %v3933_v44 = vmax.f32 %v3930_v15, 0.0 }
0x1243   :  { %4916 = vmatmul.mubr.f32.vlgmr.msra.gmra.mrb[34].mxu1 %v3933_v44 }
0x1316   :  { %v4021_v47 = vpop.f32.mrb[34].mxu1 }
0x1317   :  { %v4022_v48 = vadd.f32 %v4140_v46, %v4021_v47  ;;  %v4917_v50 = vpop.f32.mrb[35].mxu1 }
0x1319   :  { %4025 = vst [vmem:[#allocation2] sm:$0x3] %v4022_v48 }
0x131a   :  { %5389 = shalt.err (!%p5386_p4)
}
0x131b   :  { %s5390_s8 = scalar_lea.hbm %s6554_s17, 32 }
0x131c   :  { %p5391_p5 = scmp.ne.s32.totalorder %s6554_s17, %s5390_s8  ;;  %p5394_p6 = scmp.lt.u32.totalorder %s5390_s8, %s6554_s17 }
0x131e   :  { %p5396_p7 = pnand %p5394_p6, %p5391_p5 }
0x1320   :  { %5399 = shalt.err (!%p5396_p7)
}
0x1321   :  { %4035 = dma.vmem_to_hbm [thread:$0]  %s4033_s26, 32, %s6554_s17, [#allocation3]  }
0x1322   :  { %5400 = dma.done.wait [#allocation3], 32  }
0x1323   :  { %5401 = vsyncadd [#allocation3], 4294967264 }
0x1324   :  { %4039 = vsyncpa [#allocation3], 1 }

</bundles_post_ra>
